<compile_context>
chip_gen: v5e
topology: v5e:2x2
jax: 0.10.0
libtpu: 0.0.40
codegen_flags: <defaults>
</compile_context>

<pallas_src>
import jax
import jax.numpy as jnp
import numpy as np
from jax.experimental import pallas as pl
from jax.experimental.pallas import tpu as pltpu

EPS = 1e-5          # PyTorch BatchNorm default eps
NEG_SLOPE = 0.2


def _lrelu(h):
    return jnp.maximum(h, NEG_SLOPE * h)


def _mm(a_bf16, w_ref):  # bf16 operands, f32 accumulation on the MXU
    return jnp.dot(a_bf16, w_ref[...], preferred_element_type=jnp.float32)


# ------------------------- per-point (big) kernel --------------------------- #
def point_mlp_kernel(x_ref,
                     w1_ref, b1_ref,
                     w2_ref, b2_ref,
                     w3_ref, b3_ref,
                     out_ref):
    j = pl.program_id(1)
    _, k, tile_n, c_in = x_ref.shape

    # K-major rows: tile_n (sublane-aligned) is the fast row position, so the
    # merge is layout-clean for any K (no relayout copy, no K padding needed).
    x = x_ref[...].reshape(k * tile_n, c_in)                          # bf16

    # conv1: Conv2d(6->64,1x1,no bias) + BN2d(64) + LeakyReLU (BN scale folded)
    h1 = _lrelu(_mm(x, w1_ref) + b1_ref[...]).astype(jnp.bfloat16)    # (k*tile_n, 64)
    # conv2: Conv2d(64->128,1x1,no bias) + BN2d(128) + LeakyReLU
    h2 = _lrelu(_mm(h1, w2_ref) + b2_ref[...])                        # (k*tile_n, 128) f32
    # max over K neighbors: K is the outer row group -> pure VPU max.
    p1 = jnp.max(h2.reshape(k, tile_n, 128), axis=0)                  # (tile_n, 128)
    # conv3: Conv1d(128->1024,k=1,no bias) + BN1d(1024) + LeakyReLU
    h3 = _lrelu(_mm(p1.astype(jnp.bfloat16), w3_ref) + b3_ref[...])   # (tile_n, 1024)
    # 8-wide partial max over points (pure VPU); final 8->1 reduce is deferred
    # to the head kernel, once per batch element.
    partial = jnp.max(h3.reshape(tile_n // 8, 8, 1024), axis=0)       # (8, 1024)

    # running max over the N tiles, accumulated directly in the resident output
    @pl.when(j == 0)
    def _():
        out_ref[...] = jnp.full(out_ref.shape, -jnp.inf, out_ref.dtype)

    out_ref[...] = jnp.maximum(out_ref[...], partial[None])


# ------------------------------ head kernel --------------------------------- #
def head_kernel(p_ref, wl1_ref, bl1_ref, wl2_ref, bl2_ref, wt_ref, bt_ref,
                out_ref):
    # single 8->1 cross-sublane reduce (once per forward, not per grid step)
    p2 = jnp.max(p_ref[...], axis=1)                                  # (B, 1024) f32
    h4 = _lrelu(_mm(p2.astype(jnp.bfloat16), wl1_ref) + bl1_ref[...])  # linear1+BN(512)
    h5 = _lrelu(_mm(h4.astype(jnp.bfloat16), wl2_ref) + bl2_ref[...])  # linear2+BN(256)
    out_ref[...] = _mm(h5.astype(jnp.bfloat16), wt_ref) + bt_ref[...]  # Linear(256->9)


# ------------------------------ parameters ---------------------------------- #
def init_params(key):
    """Deterministic synthetic parameters matching the torch module's shapes."""
    ks = jax.random.split(key, 10)

    def bn(kg, c):
        k1, k2, k3, k4 = jax.random.split(kg, 4)
        gamma = jax.random.uniform(k1, (c,), minval=0.5, maxval=1.5)
        beta = 0.1 * jax.random.normal(k2, (c,))
        mean = 0.1 * jax.random.normal(k3, (c,))
        var = jax.random.uniform(k4, (c,), minval=0.5, maxval=1.5)
        return gamma, beta, mean, var

    p = {}
    # weights stored pre-transposed to (in, out) so the kernels do x @ W
    p["w1"] = (0.2 * jax.random.normal(ks[0], (64, 6))).T          # Conv2d(6,64,1)
    p["bn1"] = bn(ks[1], 64)
    p["w2"] = (0.1 * jax.random.normal(ks[2], (128, 64))).T        # Conv2d(64,128,1)
    p["bn2"] = bn(ks[3], 128)
    p["w3"] = (0.05 * jax.random.normal(ks[4], (1024, 128))).T     # Conv1d(128,1024,1)
    p["bn3_1024"] = bn(ks[5], 1024)                                # BN inside conv3 Sequential
    p["wl1"] = (0.05 * jax.random.normal(ks[6], (512, 1024))).T    # Linear(1024,512)
    p["bn3_512"] = bn(ks[7], 512)                                  # re-assigned self.bn3
    p["wl2"] = (0.05 * jax.random.normal(ks[8], (256, 512))).T     # Linear(512,256)
    p["bn4"] = bn(ks[9], 256)
    p["wt"] = jnp.zeros((9, 256)).T                                # init.constant_(W, 0)
    p["bt"] = jnp.eye(3).reshape(1, 9)                             # init.eye_(bias.view(3,3))
    return jax.tree_util.tree_map(lambda a: a.astype(jnp.float32), p)


def _bn_scale_bias(gamma, beta, mean, var):
    scale = gamma / jnp.sqrt(var + EPS)
    bias = beta - mean * scale
    return scale, bias


def fold_params(p):
    """Fold BN scale into weight columns (W' = W*s); keep the shift as a bias.
    Matmul operands are bf16 (accumulation stays f32 inside the kernels)."""
    def fold(w, bn):
        s, b = _bn_scale_bias(*bn)
        return (w * s[None, :]).astype(jnp.bfloat16), b[None, :].astype(jnp.float32)

    w1, b1 = fold(p["w1"], p["bn1"])
    w2, b2 = fold(p["w2"], p["bn2"])
    w3, b3 = fold(p["w3"], p["bn3_1024"])
    wl1, bl1 = fold(p["wl1"], p["bn3_512"])
    wl2, bl2 = fold(p["wl2"], p["bn4"])
    return dict(w1=w1, b1=b1, w2=w2, b2=b2, w3=w3, b3=b3,
                wl1=wl1, bl1=bl1, wl2=wl2, bl2=bl2,
                wt=p["wt"].astype(jnp.bfloat16),
                bt=p["bt"].astype(jnp.float32))


# ------------------------------ glue / wrapper ------------------------------ #
def _pick_tile_n(n, cap=256):
    # multiples of 16 preferred (bf16 sublane pack); 8 is the hard constraint.
    assert n % 8 == 0, "N must be a multiple of 8 (pad + mask padded points to -inf)"
    t = min(n, cap)
    t -= t % 8
    while n % t:
        t -= 8
    return t


def transform_net_forward(x, folded, *, tile_n=None):
    """x: (B, 6, N, K) float32 (NCHW, like the torch module). Returns (B, 3, 3)."""
    B, C, N, K = x.shape
    assert C == 6
    if tile_n is None:
        tile_n = _pick_tile_n(N)
    assert N % tile_n == 0 and tile_n % 8 == 0

    # NCHW -> K-major channels-last; cast once to bf16 for the MXU.
    # TODO(synk): upstream producer should emit (B, K, N, 6) bf16 directly so this
    # transpose does not cost an extra HBM round-trip before the kernel.
    x_km = jnp.transpose(x, (0, 3, 2, 1)).astype(jnp.bfloat16)       # (B, K, N, 6)

    point_args = (folded["w1"], folded["b1"],
                  folded["w2"], folded["b2"],
                  folded["w3"], folded["b3"])

    def resident(a):  # full array, constant block index => VMEM resident, never re-fetched
        return pl.BlockSpec(a.shape, lambda b, j: (0, 0))

    in_specs = ([pl.BlockSpec((1, K, tile_n, C), lambda b, j: (b, 0, j, 0))]
                + [resident(a) for a in point_args])
    out_spec = pl.BlockSpec((1, 8, 1024), lambda b, j: (b, 0, 0))

    rows = B * N * K
    flops = 2 * rows * (6 * 64 + 64 * 128) + 2 * B * N * 128 * 1024
    bytes_accessed = (int(x_km.size) * 2
                      + sum(int(a.size) * a.dtype.itemsize for a in point_args)
                      + B * 8 * 1024 * 4)

    pooled = pl.pallas_call(
        point_mlp_kernel,
        out_shape=jax.ShapeDtypeStruct((B, 8, 1024), jnp.float32),
        grid_spec=pltpu.PrefetchScalarGridSpec(
            num_scalar_prefetch=0,
            grid=(B, N // tile_n),
            in_specs=in_specs,
            out_specs=out_spec),
        compiler_params=pltpu.CompilerParams(
            dimension_semantics=("parallel", "arbitrary"),
            vmem_limit_bytes=32 * 1024 * 1024),
        cost_estimate=pl.CostEstimate(
            flops=int(flops), transcendentals=0,
            bytes_accessed=int(bytes_accessed)),
    )(x_km, *point_args)

    # Tiny MLP head as a second small pallas_call, batched over B (M=B matmuls),
    # so wl1/wl2/wt never sit in VMEM during the per-point loop.
    out = pl.pallas_call(
        head_kernel,
        out_shape=jax.ShapeDtypeStruct((B, 9), jnp.float32),
    )(pooled, folded["wl1"], folded["bl1"],
      folded["wl2"], folded["bl2"], folded["wt"], folded["bt"])
    return out.reshape(B, 3, 3)


def reference_forward(x, f):
    """Pure-JAX reference with the same bf16-operand / f32-accumulate numerics."""
    B, C, N, K = x.shape
    mm = lambda a, w: jnp.dot(a.astype(jnp.bfloat16), w,
                              preferred_element_type=jnp.float32)
    h = jnp.transpose(x, (0, 2, 3, 1)).reshape(-1, C).astype(jnp.bfloat16)
    h = _lrelu(mm(h, f["w1"]) + f["b1"])
    h = _lrelu(mm(h, f["w2"]) + f["b2"])
    h = h.reshape(B * N, K, -1).max(axis=1)
    h = _lrelu(mm(h, f["w3"]) + f["b3"])
    h = h.reshape(B, N, -1).max(axis=1)
    h = _lrelu(mm(h, f["wl1"]) + f["bl1"])
    h = _lrelu(mm(h, f["wl2"]) + f["bl2"])
    return (mm(h, f["wt"]) + f["bt"]).reshape(B, 3, 3)


if __name__ == "__main__":
    key = jax.random.PRNGKey(0)
    k_x, k_p, k_w = jax.random.split(key, 3)

    # K-major layout needs no K padding; N is a multiple of 8 (here 64).
    B, N, K = 2, 64, 20
    x = jax.random.normal(k_x, (B, 6, N, K), dtype=jnp.float32)

    params = init_params(k_p)

    # (a) validate the full compute path with a non-trivial transform weight,
    #     and a tile_n that exercises the multi-step running-max accumulator.
    folded_rnd = fold_params(params)
    folded_rnd = dict(folded_rnd,
                      wt=(0.1 * jax.random.normal(k_w, (256, 9))).astype(jnp.bfloat16))
    out_rnd = jax.block_until_ready(transform_net_forward(x, folded_rnd, tile_n=16))
    ref_rnd = reference_forward(x, folded_rnd)
    np.testing.assert_allclose(np.asarray(out_rnd), np.asarray(ref_rnd),
                               rtol=1e-3, atol=1e-3)

    # (b) with the module's own init (transform.weight == 0, bias == eye(3)) the
    #     output must be the identity matrix for every batch element.
    folded = fold_params(params)
    out = jax.block_until_ready(transform_net_forward(x, folded))
    assert out.shape == (B, 3, 3)
    np.testing.assert_allclose(np.asarray(out),
                               np.broadcast_to(np.eye(3), (B, 3, 3)),
                               rtol=1e-5, atol=1e-5)

    print("KERNEL_OK")
</pallas_src>

<mosaic_0001>
module attributes {stable_mosaic.version = 11 : i64} {
  func.func @point_mlp_kernel(%arg0: i32, %arg1: i32, %arg2: memref<1x20x16x6xbf16, #tpu.memory_space<vmem>>, %arg3: memref<6x64xbf16, #tpu.memory_space<vmem>>, %arg4: memref<1x64xf32, #tpu.memory_space<vmem>>, %arg5: memref<64x128xbf16, #tpu.memory_space<vmem>>, %arg6: memref<1x128xf32, #tpu.memory_space<vmem>>, %arg7: memref<128x1024xbf16, #tpu.memory_space<vmem>>, %arg8: memref<1x1024xf32, #tpu.memory_space<vmem>>, %arg9: memref<1x8x1024xf32, #tpu.memory_space<vmem>>) attributes {dimension_semantics = [#tpu.dimension_semantics<parallel>, #tpu.dimension_semantics<arbitrary>], iteration_bounds = array<i64: 2, 4>, scalar_prefetch = 0 : i64, scratch_operands = 0 : i64, tpu.core_type = #tpu.core_type<tc>, window_params = [{transform_indices = @transform_0, window_bounds = array<i64: 1, 20, 16, 6>}, {pipeline_mode = #tpu.pipeline_mode<synchronous>, transform_indices = @transform_1, window_bounds = array<i64: 6, 64>}, {pipeline_mode = #tpu.pipeline_mode<synchronous>, transform_indices = @transform_2, window_bounds = array<i64: 1, 64>}, {pipeline_mode = #tpu.pipeline_mode<synchronous>, transform_indices = @transform_3, window_bounds = array<i64: 64, 128>}, {pipeline_mode = #tpu.pipeline_mode<synchronous>, transform_indices = @transform_4, window_bounds = array<i64: 1, 128>}, {pipeline_mode = #tpu.pipeline_mode<synchronous>, transform_indices = @transform_5, window_bounds = array<i64: 128, 1024>}, {pipeline_mode = #tpu.pipeline_mode<synchronous>, transform_indices = @transform_6, window_bounds = array<i64: 1, 1024>}, {transform_indices = @transform_7, window_bounds = array<i64: 1, 8, 1024>}]} {
    %c0 = arith.constant 0 : index
    %c0_0 = arith.constant 0 : index
    %c0_1 = arith.constant 0 : index
    %c0_2 = arith.constant 0 : index
    %0 = vector.load %arg2[%c0, %c0_0, %c0_1, %c0_2] : memref<1x20x16x6xbf16, #tpu.memory_space<vmem>>, vector<1x20x16x6xbf16>
    %1 = vector.shape_cast %0 : vector<1x20x16x6xbf16> to vector<320x6xbf16>
    %c0_3 = arith.constant 0 : index
    %c0_4 = arith.constant 0 : index
    %2 = vector.load %arg3[%c0_3, %c0_4] : memref<6x64xbf16, #tpu.memory_space<vmem>>, vector<6x64xbf16>
    %cst = arith.constant dense<0.000000e+00> : vector<320x64xf32>
    %3 = tpu.matmul %1, %2, %cst {dimension_numbers = #tpu.dot_dimension_numbers<[1], [0], [0], [1], [0, 0, 1, 1], [], []>} : vector<320x6xbf16>, vector<6x64xbf16>, vector<320x64xf32> -> vector<320x64xf32>
    %c0_5 = arith.constant 0 : index
    %c0_6 = arith.constant 0 : index
    %4 = vector.load %arg4[%c0_5, %c0_6] : memref<1x64xf32, #tpu.memory_space<vmem>>, vector<1x64xf32>
    %5 = vector.broadcast %4 : vector<1x64xf32> to vector<320x64xf32>
    %6 = arith.addf %3, %5 : vector<320x64xf32>
    %cst_7 = arith.constant 2.000000e-01 : f32
    %7 = vector.broadcast %cst_7 : f32 to vector<320x64xf32>
    %8 = arith.mulf %7, %6 : vector<320x64xf32>
    %9 = arith.maximumf %6, %8 : vector<320x64xf32>
    %10 = arith.truncf %9 : vector<320x64xf32> to vector<320x64xbf16>
    %c0_8 = arith.constant 0 : index
    %c0_9 = arith.constant 0 : index
    %11 = vector.load %arg5[%c0_8, %c0_9] : memref<64x128xbf16, #tpu.memory_space<vmem>>, vector<64x128xbf16>
    %cst_10 = arith.constant dense<0.000000e+00> : vector<320x128xf32>
    %12 = tpu.matmul %10, %11, %cst_10 {dimension_numbers = #tpu.dot_dimension_numbers<[1], [0], [0], [1], [0, 0, 1, 1], [], []>} : vector<320x64xbf16>, vector<64x128xbf16>, vector<320x128xf32> -> vector<320x128xf32>
    %c0_11 = arith.constant 0 : index
    %c0_12 = arith.constant 0 : index
    %13 = vector.load %arg6[%c0_11, %c0_12] : memref<1x128xf32, #tpu.memory_space<vmem>>, vector<1x128xf32>
    %14 = vector.broadcast %13 : vector<1x128xf32> to vector<320x128xf32>
    %15 = arith.addf %12, %14 : vector<320x128xf32>
    %cst_13 = arith.constant 2.000000e-01 : f32
    %16 = vector.broadcast %cst_13 : f32 to vector<320x128xf32>
    %17 = arith.mulf %16, %15 : vector<320x128xf32>
    %18 = arith.maximumf %15, %17 : vector<320x128xf32>
    %19 = vector.shape_cast %18 : vector<320x128xf32> to vector<20x16x128xf32>
    %cst_14 = arith.constant dense<0xFF800000> : vector<16x128xf32>
    %20 = vector.multi_reduction <maximumf>, %19, %cst_14 [0] : vector<20x16x128xf32> to vector<16x128xf32>
    %21 = arith.truncf %20 : vector<16x128xf32> to vector<16x128xbf16>
    %c0_15 = arith.constant 0 : index
    %c0_16 = arith.constant 0 : index
    %22 = vector.load %arg7[%c0_15, %c0_16] : memref<128x1024xbf16, #tpu.memory_space<vmem>>, vector<128x1024xbf16>
    %cst_17 = arith.constant dense<0.000000e+00> : vector<16x1024xf32>
    %23 = tpu.matmul %21, %22, %cst_17 {dimension_numbers = #tpu.dot_dimension_numbers<[1], [0], [0], [1], [0, 0, 1, 1], [], []>} : vector<16x128xbf16>, vector<128x1024xbf16>, vector<16x1024xf32> -> vector<16x1024xf32>
    %c0_18 = arith.constant 0 : index
    %c0_19 = arith.constant 0 : index
    %24 = vector.load %arg8[%c0_18, %c0_19] : memref<1x1024xf32, #tpu.memory_space<vmem>>, vector<1x1024xf32>
    %25 = vector.broadcast %24 : vector<1x1024xf32> to vector<16x1024xf32>
    %26 = arith.addf %23, %25 : vector<16x1024xf32>
    %cst_20 = arith.constant 2.000000e-01 : f32
    %27 = vector.broadcast %cst_20 : f32 to vector<16x1024xf32>
    %28 = arith.mulf %27, %26 : vector<16x1024xf32>
    %29 = arith.maximumf %26, %28 : vector<16x1024xf32>
    %30 = vector.shape_cast %29 : vector<16x1024xf32> to vector<2x8x1024xf32>
    %cst_21 = arith.constant dense<0xFF800000> : vector<8x1024xf32>
    %31 = vector.multi_reduction <maximumf>, %30, %cst_21 [0] : vector<2x8x1024xf32> to vector<8x1024xf32>
    %c0_i32 = arith.constant 0 : i32
    %32 = arith.cmpi eq, %arg1, %c0_i32 : i32
    %33 = arith.extui %32 : i1 to i32
    %c0_i32_22 = arith.constant 0 : i32
    %34 = arith.cmpi ne, %33, %c0_i32_22 : i32
    scf.if %34 {
      %cst_29 = arith.constant 0xFF800000 : f32
      %39 = vector.broadcast %cst_29 : f32 to vector<1x8x1024xf32>
      %c0_30 = arith.constant 0 : index
      %c0_31 = arith.constant 0 : index
      %c0_32 = arith.constant 0 : index
      %40 = vector.load %arg9[%c0_30, %c0_31, %c0_32] : memref<1x8x1024xf32, #tpu.memory_space<vmem>>, vector<1x8x1024xf32>
      tpu.vector_store %arg9[%c0_30, %c0_31, %c0_32], %39 {strides = array<i32>} : memref<1x8x1024xf32, #tpu.memory_space<vmem>>, vector<1x8x1024xf32>,
    } else {
    }
    %c0_23 = arith.constant 0 : index
    %c0_24 = arith.constant 0 : index
    %c0_25 = arith.constant 0 : index
    %35 = vector.load %arg9[%c0_23, %c0_24, %c0_25] : memref<1x8x1024xf32, #tpu.memory_space<vmem>>, vector<1x8x1024xf32>
    %36 = vector.shape_cast %31 : vector<8x1024xf32> to vector<1x8x1024xf32>
    %37 = arith.maximumf %35, %36 : vector<1x8x1024xf32>
    %c0_26 = arith.constant 0 : index
    %c0_27 = arith.constant 0 : index
    %c0_28 = arith.constant 0 : index
    %38 = vector.load %arg9[%c0_26, %c0_27, %c0_28] : memref<1x8x1024xf32, #tpu.memory_space<vmem>>, vector<1x8x1024xf32>
    tpu.vector_store %arg9[%c0_26, %c0_27, %c0_28], %37 {strides = array<i32>} : memref<1x8x1024xf32, #tpu.memory_space<vmem>>, vector<1x8x1024xf32>,
    return
  }
  func.func @transform_0(%arg0: i32, %arg1: i32) -> (i32, i32, i32, i32) {
    %c0_i32 = arith.constant 0 : i32
    %c0_i32_0 = arith.constant 0 : i32
    %c0_i32_1 = arith.constant 0 : i32
    return %arg0, %c0_i32, %arg1, %c0_i32_0 : i32, i32, i32, i32
  }
  func.func @transform_1(%arg0: i32, %arg1: i32) -> (i32, i32) {
    %c0_i32 = arith.constant 0 : i32
    %c0_i32_0 = arith.constant 0 : i32
    %c0_i32_1 = arith.constant 0 : i32
    return %c0_i32, %c0_i32_0 : i32, i32
  }
  func.func @transform_2(%arg0: i32, %arg1: i32) -> (i32, i32) {
    %c0_i32 = arith.constant 0 : i32
    %c0_i32_0 = arith.constant 0 : i32
    %c0_i32_1 = arith.constant 0 : i32
    return %c0_i32, %c0_i32_0 : i32, i32
  }
  func.func @transform_3(%arg0: i32, %arg1: i32) -> (i32, i32) {
    %c0_i32 = arith.constant 0 : i32
    %c0_i32_0 = arith.constant 0 : i32
    %c0_i32_1 = arith.constant 0 : i32
    return %c0_i32, %c0_i32_0 : i32, i32
  }
  func.func @transform_4(%arg0: i32, %arg1: i32) -> (i32, i32) {
    %c0_i32 = arith.constant 0 : i32
    %c0_i32_0 = arith.constant 0 : i32
    %c0_i32_1 = arith.constant 0 : i32
    return %c0_i32, %c0_i32_0 : i32, i32
  }
  func.func @transform_5(%arg0: i32, %arg1: i32) -> (i32, i32) {
    %c0_i32 = arith.constant 0 : i32
    %c0_i32_0 = arith.constant 0 : i32
    %c0_i32_1 = arith.constant 0 : i32
    return %c0_i32, %c0_i32_0 : i32, i32
  }
  func.func @transform_6(%arg0: i32, %arg1: i32) -> (i32, i32) {
    %c0_i32 = arith.constant 0 : i32
    %c0_i32_0 = arith.constant 0 : i32
    %c0_i32_1 = arith.constant 0 : i32
    return %c0_i32, %c0_i32_0 : i32, i32
  }
  func.func @transform_7(%arg0: i32, %arg1: i32) -> (i32, i32, i32) {
    %c0_i32 = arith.constant 0 : i32
    %c0_i32_0 = arith.constant 0 : i32
    %c0_i32_1 = arith.constant 0 : i32
    return %arg0, %c0_i32, %c0_i32_0 : i32, i32, i32
  }
}

</mosaic_0001>

<bundles_post_ra>
// kernel: tpu_custom_call.1
= control target key start
LH: loop header
LB: loop body
LE: loop exit
PB: predicated region body
PF: predicated region fallthrough
CT: control target
= control target key end

     0   :  { %s3538_s0 = inlined_call_operand.vmem [shape: bf16[2,20,64,6], index: 0, kind: input, shape index: {}]   ;;  %s3539_s1 = inlined_call_operand.vmem [shape: bf16[6,64], index: 1, kind: input, shape index: {}]   ;;  %s3540_s2 = inlined_call_operand.vmem [shape: f32[1,64], index: 2, kind: input, shape index: {}]   ;;  %s3541_s3 = inlined_call_operand.vmem [shape: bf16[64,128], index: 3, kind: input, shape index: {}]   ;;  %s3542_s4 = inlined_call_operand.vmem [shape: f32[1,128], index: 4, kind: input, shape index: {}]   ;;  %s3543_s5 = inlined_call_operand.vmem [shape: bf16[128,1024], index: 5, kind: input, shape index: {}]   ;;  %s3544_s6 = inlined_call_operand.vmem [shape: f32[1,1024], index: 6, kind: input, shape index: {}]   ;;  %s3545_s7 = inlined_call_operand.hbm [shape: f32[2,8,1024], index: 7, kind: output, shape index: {}]  }
   0x1   :  { %3550 = sst [smem:[#allocation9_spill]] %s3538_s0 }
   0x2   :  { %3551 = sst [smem:[#allocation10_spill]] %s3539_s1 }
   0x3   :  { %12 = vsyncpa [#allocation4], 0 }
   0x4   :  { %14 = vsyncpa [#allocation4 + $0x1], 0  ;;  %s2671_s24 = smov 0   ;;  %s2673_s25 = smov 0  }
   0x5   :  { %s2675_s26 = smov 0   ;;  %s2677_s27 = smov 0  }
   0x6   :  { %s2679_s28 = smov 0   ;;  %s2681_s29 = smov 0  }
   0x7   :  { %s2683_s30 = smov 0   ;;  %s2685_s8 = smov 0  }
   0x8   :  { %s2687_s9 = smov 0   ;;  %s2689_s10 = smov 0  }
   0x9 LB: > { %s1925_s11 = sadd.s32 4294967295, %s2628_s10   ;;  %s1926_s12 = sadd.s32 4294967294, %s2628_s10   ;;  %s2628_s10 = sphi %s2689_s10, %s20_s10   ;;  %s2624_s9 = sphi %s2687_s9, %s3572_s9   ;;  %s2620_s8 = sphi %s2685_s8, %s3571_s8   ;;  %s2616_s30 = sphi %s2683_s30, %s3570_s30   ;;  %s2612_s29 = sphi %s2681_s29, %s3569_s29   ;;  %s2608_s28 = sphi %s2679_s28, %s3568_s28   ;;  %s2604_s27 = sphi %s2677_s27, %s3567_s27   ;;  %s2600_s26 = sphi %s2675_s26, %s3566_s26   ;;  %s2596_s25 = sphi %s2673_s25, %s3565_s25   ;;  %s2592_s24 = sphi %s2671_s24, %s3564_s24  }
   0xa   : > { %s29_s13 = sadd.s32 1, %s2620_s8  ;;  %s32_s14 = sadd.s32 1, %s2624_s9 }
   0xb   : > { %p30_p0 = scmp.ge.s32.totalorder %s29_s13, 4  ;;  %s41_s15 = sadd.s32 1, %s2608_s28 }
   0xc   : > { %p48_p1 = scmp.ne.s32.totalorder %s2608_s28, %s2604_s27  ;;  %p49_p2 = scmp.eq.s32.totalorder %s2628_s10, 0 }
   0xd   : > { %s3574_s13 = smov (%p30_p0, %s29_s13), 0  ;;  %s3576_s14 = smov (!%p30_p0, %s32_s14), %s2624_s9 }
   0xe   : > { %3552 = sst [smem:[#allocation6_spill]] %s3574_s13  ;;  %s37_s16 = ssub.s32 %s2620_s8, %s3574_s13 }
   0xf   : > { %p2734_p3 = por %p49_p2, %p48_p1  ;;  %p34_p4 = scmp.ge.s32.totalorder %s3576_s14, 2 }
  0x10   : > { %s193_s18 = sadd.s32 1, %s2600_s26  ;;  %p203_p5 = scmp.ne.s32.totalorder %s2600_s26, %s2596_s25 }
  0x11   : > { %p204_p6 = scmp.eq.s32.totalorder %s1925_s11, 7  ;;  %s3578_s14 = smov (%p34_p4, %s3576_s14), 0 }
  0x12   : > { %3554 = sst [smem:[#allocation7_spill]] %s3578_s14  ;;  %p209_p8 = scmp.ne.s32.totalorder %s2596_s25, %s2592_s24 }
  0x13   : > { %p2743_p7 = por %p204_p6, %p203_p5  ;;  %s36_s20 = ssub.s32 %s2624_s9, %s3578_s14 }
  0x14   : > { %p210_p9 = scmp.eq.s32.totalorder %s1926_s12, 7  ;;  %s38_s21 = sor.u32 %s37_s16, %s36_s20 }
  0x15   : > { %p191_p10 = scmp.eq.s32.totalorder %s36_s20, 0  ;;  %p39_p11 = scmp.eq.s32.totalorder %s38_s21, 0 }
  0x16   : > { %p2751_p12 = por %p210_p9, %p209_p8  ;;  %p1928_p13 = scmp.ge.s32.totalorder %s2628_s10, 8 }
  0x17   : > { %s2756_s23 = scalar_select %p191_p10, %s2600_s26, %s193_s18  }
  0x18   : > { %s3556_s22 = scalar_select %p2751_p12, 1, 0 }
  0x19   : > { %s2759_s11 = scalar_select %p39_p11, %s2608_s28, %s41_s15  }
  0x1a   : > { %3557 = sst [smem:[#allocation8_spill]] %s3556_s22  ;;  %244 = sbr.rel (%p1928_p13) target bundleno = 61 (0x3d), region = 40 }
  0x1f   : > { %247 = sbr.rel (!%p2734_p3) target bundleno = 61 (0x3d), region = 44  ;;  %s249_s12 = sand.u32 (%p2734_p3), 1, %s2608_s28  }
  0x20   : > { %s2425_s16 = smul.u32 (%p2734_p3), 160, %s249_s12  ;;  %s1929_s20 = sshll.u32 (%p2734_p3), %s2620_s8, 1 }
  0x21   : > { %s2426_s21 = smul.u32 (%p2734_p3), 160, %s2624_s9  ;;  %s3558_s0 = sld [smem:[#allocation9_spill]] (%p2734_p3) }
  0x22   : > { %s2775_s17 = scalar_lea.vmem (%p2734_p3), [#allocation2], %s2425_s16 }
  0x23   : > { %s254_s14 = sadd.s32 (%p2734_p3), %s2426_s21, %s1929_s20 }
  0x24   : > { %s1930_s13 = sshll.u32 %s254_s14, 2 }
  0x27   : > { %s2770_s15 = scalar_lea.vmem %s3558_s0, %s1930_s13 }
  0x28   : > { %v273_v0 = vld [vmem:[%s2770_s15] sm:$0xff]  }
  0x29   : > { %v277_v1 = vld [vmem:[%s2770_s15 + $0x20] sm:$0xff]   ;;  %274 = vst [vmem:[%s2775_s17] sm:$0xff] %v273_v0  }
  0x2a   : > { %v281_v2 = vld [vmem:[%s2770_s15 + $0x40] sm:$0xff]   ;;  %278 = vst [vmem:[%s2775_s17 + $0x8] sm:$0xff] %v277_v1  }
  0x2b   : > { %v285_v3 = vld [vmem:[%s2770_s15 + $0x60] sm:$0xff]   ;;  %282 = vst [vmem:[%s2775_s17 + $0x10] sm:$0xff] %v281_v2  }
  0x2c   : > { %v289_v4 = vld [vmem:[%s2770_s15 + $0x80] sm:$0xff]   ;;  %286 = vst [vmem:[%s2775_s17 + $0x18] sm:$0xff] %v285_v3  }
  0x2d   : > { %v293_v5 = vld [vmem:[%s2770_s15 + $0xa0] sm:$0xff]   ;;  %290 = vst [vmem:[%s2775_s17 + $0x20] sm:$0xff] %v289_v4  }
  0x2e   : > { %v297_v6 = vld [vmem:[%s2770_s15 + $0xc0] sm:$0xff]   ;;  %294 = vst [vmem:[%s2775_s17 + $0x28] sm:$0xff] %v293_v5  }
  0x2f   : > { %v301_v7 = vld [vmem:[%s2770_s15 + $0xe0] sm:$0xff]   ;;  %298 = vst [vmem:[%s2775_s17 + $0x30] sm:$0xff] %v297_v6  }
  0x30   : > { %v305_v8 = vld [vmem:[%s2770_s15 + $0x100] sm:$0xff]   ;;  %302 = vst [vmem:[%s2775_s17 + $0x38] sm:$0xff] %v301_v7  }
  0x31   : > { %v309_v9 = vld [vmem:[%s2770_s15 + $0x120] sm:$0xff]   ;;  %306 = vst [vmem:[%s2775_s17 + $0x40] sm:$0xff] %v305_v8  }
  0x32   : > { %v313_v10 = vld [vmem:[%s2770_s15 + $0x140] sm:$0xff]   ;;  %310 = vst [vmem:[%s2775_s17 + $0x48] sm:$0xff] %v309_v9  }
  0x33   : > { %v317_v11 = vld [vmem:[%s2770_s15 + $0x160] sm:$0xff]   ;;  %314 = vst [vmem:[%s2775_s17 + $0x50] sm:$0xff] %v313_v10  }
  0x34   : > { %v321_v12 = vld [vmem:[%s2770_s15 + $0x180] sm:$0xff]   ;;  %318 = vst [vmem:[%s2775_s17 + $0x58] sm:$0xff] %v317_v11  }
  0x35   : > { %v325_v13 = vld [vmem:[%s2770_s15 + $0x1a0] sm:$0xff]   ;;  %322 = vst [vmem:[%s2775_s17 + $0x60] sm:$0xff] %v321_v12  }
  0x36   : > { %v329_v14 = vld [vmem:[%s2770_s15 + $0x1c0] sm:$0xff]   ;;  %326 = vst [vmem:[%s2775_s17 + $0x68] sm:$0xff] %v325_v13  }
  0x37   : > { %v333_v15 = vld [vmem:[%s2770_s15 + $0x1e0] sm:$0xff]   ;;  %330 = vst [vmem:[%s2775_s17 + $0x70] sm:$0xff] %v329_v14  }
  0x38   : > { %v337_v16 = vld [vmem:[%s2770_s15 + $0x200] sm:$0xff]   ;;  %334 = vst [vmem:[%s2775_s17 + $0x78] sm:$0xff] %v333_v15  }
  0x39   : > { %v341_v17 = vld [vmem:[%s2770_s15 + $0x220] sm:$0xff]   ;;  %338 = vst [vmem:[%s2775_s17 + $0x80] sm:$0xff] %v337_v16  }
  0x3a   : > { %v345_v18 = vld [vmem:[%s2770_s15 + $0x240] sm:$0xff]   ;;  %342 = vst [vmem:[%s2775_s17 + $0x88] sm:$0xff] %v341_v17  }
  0x3b   : > { %v349_v19 = vld [vmem:[%s2770_s15 + $0x260] sm:$0xff]   ;;  %346 = vst [vmem:[%s2775_s17 + $0x90] sm:$0xff] %v345_v18  }
  0x3c   : > { %350 = vst [vmem:[%s2775_s17 + $0x98] sm:$0xff] %v349_v19  }
  0x3d PF: > { %p1931_p0 = scmp.ge.s32.totalorder %s2628_s10, 1  ;;  %p455_p1 = scmp.lt.s32.totalorder %s2628_s10, 9 }
  0x3f   : > { %p456_p2 = pnand %p1931_p0, %p455_p1 }
  0x40   : > { %s3549_s13 = sand.u32 (!%p456_p2), 1, %s2596_s25   ;;  %s3559_s1 = sld [smem:[#allocation10_spill]] (!%p456_p2) }
  0x41   : > { %459 = sbr.rel (%p456_p2) target bundleno = 812 (0x32c), region = 85  ;;  %s462_s12 = sand.u32 (!%p456_p2), 1, %s2604_s27  }
  0x42   : > { %s2823_s16 = sshll.u32 (!%p456_p2), %s3549_s13, 6  ;;  %s2427_s20 = smul.u32 (!%p456_p2), 160, %s462_s12 }
  0x43   : > { %s3456_s22 = scalar_lea.vmem (!%p456_p2), [#allocation3], %s2823_s16  ;;  %p2325_p3 = scmp.ne.s32.totalorder (!%p456_p2), %s2612_s29, 0 }
  0x44   : > { %s2825_s21 = scalar_lea.vmem (!%p456_p2), [#allocation2], %s2427_s20 }
  0x46   : > { %v535_v20 = vld [vmem:[%s3559_s1] sm:$0x7]  ;;  %vm701_vm0 = vcmask 1042432   ;;  %vm640_vm1 = vcmask 48128   ;;  %v2332_v23 = vld [vmem:[%s2825_s21 + $0x8] sm:$0xff]  ;;  %v2333_v24 = vld [vmem:[%s2825_s21 + $0x10] sm:$0xff] }
  0x47   : > { %v703_v21 = vsel %vm701_vm0, %v535_v20, 0  ;;  %v2331_v22 = vld [vmem:[%s2825_s21] sm:$0xff]  ;;  %v2334_v25 = vld [vmem:[%s2825_s21 + $0x18] sm:$0xff]  ;;  %v2345_v27 = vld [vmem:[%s2825_s21 + $0x70] sm:$0xff]  ;;  %vm950_vm2 = vcmask 523264  }
  0x48   : > { %712 = vmatpush.bf16.msra.mxu0 %v703_v21  ;;  %2420 = vmatpush.bf16.msra.mxu3 %v703_v21  ;;  %v2335_v26 = vld [vmem:[%s2825_s21 + $0x20] sm:$0xff]  ;;  %v2336_v28 = vld [vmem:[%s2825_s21 + $0x28] sm:$0xff]  ;;  %v2346_v29 = vld [vmem:[%s2825_s21 + $0x78] sm:$0xff] }
  0x49   : > { %v2337_v30 = vld [vmem:[%s2825_s21 + $0x30] sm:$0xff]  ;;  %v2354_v31 = vld [vmem:[%s3541_s3 + $0x18] sm:$0xff]  ;;  %v2347_v33 = vld [vmem:[%s2825_s21 + $0x80] sm:$0xff] }
  0x4a   : > { %1015 = vmatpush.bf16.msra.mxu1 %v2354_v31  ;;  %2421 = vmatpush.bf16.msra.mxu2 %v2354_v31  ;;  %v2353_v32 = vld [vmem:[%s3541_s3 + $0x10] sm:$0xff]  ;;  %v2352_v34 = vld [vmem:[%s3541_s3 + $0x8] sm:$0xff]  ;;  %v2351_v35 = vld [vmem:[%s3541_s3] sm:$0xff] }
  0x4b   : > { %2013 = vmatmul.msk.bf16.vlgmr.msra.gmra.mxu0 %vm640_vm1, %v2331_v22  ;;  %2027 = vmatmul.msk.bf16.vlgmr.msra.gmra.mxu3 %vm640_vm1, %v2345_v27  ;;  %v2338_v36 = vld [vmem:[%s2825_s21 + $0x38] sm:$0xff]  ;;  %v2348_v37 = vld [vmem:[%s2825_s21 + $0x88] sm:$0xff]  ;;  %v2339_v38 = vld [vmem:[%s2825_s21 + $0x40] sm:$0xff] }
  0x4c   : > { %v2867_v40 = vld [vmem:[%s3540_s2] ss:$0 sm:$0xff]  ;;  %v2349_v42 = vld [vmem:[%s2825_s21 + $0x90] sm:$0xff]  ;;  %v2340_v50 = vld [vmem:[%s2825_s21 + $0x48] sm:$0xff] }
  0x4d   : > { %v2350_v53 = vld [vmem:[%s2825_s21 + $0x98] sm:$0xff]  ;;  %v2341_v61 = vld [vmem:[%s2825_s21 + $0x50] sm:$0xff]  ;;  %v2343_v17 = vld [vmem:[%s2825_s21 + $0x60] sm:$0xff] }
  0x4e   : > { %1016 = vmatpush.bf16.msra.mxu1 %v2353_v32  ;;  %2422 = vmatpush.bf16.msra.mxu2 %v2353_v32  ;;  %v2342_v7 = vld [vmem:[%s2825_s21 + $0x58] sm:$0xff] }
  0x52   : > { %1017 = vmatpush.bf16.msra.mxu1 %v2352_v34  ;;  %2423 = vmatpush.bf16.msra.mxu2 %v2352_v34 }
  0x56   : > { %1018 = vmatpush.bf16.msra.mxu1 %v2351_v35  ;;  %2424 = vmatpush.bf16.msra.mxu2 %v2351_v35 }
  0x5b   : > { %2014 = vmatmul.msk.bf16.gmra.mxu0 %vm640_vm1, %v2332_v23  ;;  %2028 = vmatmul.msk.bf16.gmra.mxu3 %vm640_vm1, %v2346_v29 }
  0x6b   : > { %2015 = vmatmul.msk.bf16.gmra.mxu0 %vm640_vm1, %v2333_v24  ;;  %2029 = vmatmul.msk.bf16.gmra.mxu3 %vm640_vm1, %v2347_v33 }
  0x7b   : > { %2016 = vmatmul.msk.bf16.gmra.mxu0 %vm640_vm1, %v2334_v25  ;;  %2030 = vmatmul.msk.bf16.gmra.mxu3 %vm640_vm1, %v2348_v37 }
  0x8b   : > { %2017 = vmatmul.msk.bf16.gmra.mxu0 %vm640_vm1, %v2335_v26  ;;  %2031 = vmatmul.msk.bf16.gmra.mxu3 %vm640_vm1, %v2349_v42 }
  0x9b   : > { %2018 = vmatmul.msk.bf16.gmra.mxu0 %vm640_vm1, %v2336_v28  ;;  %2032 = vmatmul.msk.bf16.gmra.mxu3 %vm640_vm1, %v2350_v53  ;;  %v2344_v28 = vld [vmem:[%s2825_s21 + $0x68] sm:$0xff] }
  0xab   : > { %2019 = vmatmul.msk.bf16.gmra.mxu0 %vm640_vm1, %v2337_v30 }
  0xbb   : > { %2020 = vmatmul.msk.bf16.gmra.mxu0 %vm640_vm1, %v2338_v36 }
  0xc8   : > { %v714_v39 = vpop.f32.mrf.mxu0 }
  0xc9   : > { %v715_v41 = vadd.f32 %v2867_v40, %v714_v39 }
  0xcb   : > { %2021 = vmatmul.msk.bf16.gmra.mxu0 %vm640_vm1, %v2339_v38  ;;  %v814_v44 = vmul.f32 0.2, %v715_v41 }
  0xcd   : > { %v854_v47 = vmax.f32 %v715_v41, %v814_v44 }
  0xce   : > { %v784_v24 = vpop.f32.mrf.mxu3 }
  0xcf   : > { %v785_v29 = vadd.f32 %v2867_v40, %v784_v24 }
  0xd0   : > { %v716_v43 = vpop.f32.mrf.mxu0 }
  0xd1   : > { %v717_v45 = vadd.f32 %v2867_v40, %v716_v43  ;;  %v842_v31 = vmul.f32 0.2, %v785_v29 }
  0xd3   : > { %v815_v46 = vmul.f32 0.2, %v717_v45  ;;  %v882_v35 = vmax.f32 %v785_v29, %v842_v31 }
  0xd5   : > { %v855_v48 = vmax.f32 %v717_v45, %v815_v46 }
  0xd6   : > { %v786_v32 = vpop.f32.mrf.mxu3 }
  0xd7   : > { %v894_v49 = vpack.c.bf16 %v855_v48, %v854_v47  ;;  %v787_v34 = vadd.f32 %v2867_v40, %v786_v32 }
  0xd8   : > { %v719_v51 = vpop.f32.mrf.mxu0 }
  0xd9   : > { %2049 = vmatmul.msk.bf16.vlgmr.msra.gmra.mxu1 %vm950_vm2, %v894_v49  ;;  %v720_v52 = vadd.f32 %v2867_v40, %v719_v51  ;;  %v843_v36 = vmul.f32 0.2, %v787_v34 }
  0xdb   : > { %2022 = vmatmul.msk.bf16.gmra.mxu0 %vm640_vm1, %v2340_v50  ;;  %v816_v55 = vmul.f32 0.2, %v720_v52  ;;  %v883_v41 = vmax.f32 %v787_v34, %v843_v36 }
  0xdd   : > { %v856_v58 = vmax.f32 %v720_v52, %v816_v55  ;;  %v908_v43 = vpack.c.bf16 %v883_v41, %v882_v35 }
  0xde   : > { %v789_v44 = vpop.f32.mrf.mxu3 }
  0xdf   : > { %2063 = vmatmul.msk.bf16.vlgmr.msra.gmra.mxu2 %vm950_vm2, %v908_v43  ;;  %v790_v48 = vadd.f32 %v2867_v40, %v789_v44 }
  0xe0   : > { %v721_v54 = vpop.f32.mrf.mxu0 }
  0xe1   : > { %v722_v56 = vadd.f32 %v2867_v40, %v721_v54  ;;  %v844_v50 = vmul.f32 0.2, %v790_v48 }
  0xe3   : > { %v817_v57 = vmul.f32 0.2, %v722_v56  ;;  %v884_v54 = vmax.f32 %v790_v48, %v844_v50 }
  0xe5   : > { %v857_v59 = vmax.f32 %v722_v56, %v817_v57 }
  0xe6   : > { %v791_v51 = vpop.f32.mrf.mxu3 }
  0xe7   : > { %v895_v60 = vpack.c.bf16 %v857_v59, %v856_v58  ;;  %v792_v53 = vadd.f32 %v2867_v40, %v791_v51 }
  0xe8   : > { %v724_v62 = vpop.f32.mrf.mxu0 }
  0xe9   : > { %2050 = vmatmul.msk.bf16.gmra.mxu1 %vm950_vm2, %v895_v60  ;;  %v725_v63 = vadd.f32 %v2867_v40, %v724_v62  ;;  %v845_v55 = vmul.f32 0.2, %v792_v53 }
  0xeb   : > { %2023 = vmatmul.msk.bf16.gmra.mxu0 %vm640_vm1, %v2341_v61  ;;  %v818_v1 = vmul.f32 0.2, %v725_v63  ;;  %v885_v59 = vmax.f32 %v792_v53, %v845_v55 }
  0xed   : > { %v858_v4 = vmax.f32 %v725_v63, %v818_v1  ;;  %v909_v61 = vpack.c.bf16 %v885_v59, %v884_v54 }
  0xee   : > { %v794_v62 = vpop.f32.mrf.mxu3 }
  0xef   : > { %2064 = vmatmul.msk.bf16.gmra.mxu2 %vm950_vm2, %v909_v61 }
  0xf0   : > { %v726_v0 = vpop.f32.mrf.mxu0 }
  0xf1   : > { %v727_v2 = vadd.f32 %v2867_v40, %v726_v0 }
  0xf3   : > { %v819_v3 = vmul.f32 0.2, %v727_v2 }
  0xf5   : > { %v859_v5 = vmax.f32 %v727_v2, %v819_v3  ;;  %v795_v2 = vadd.f32 %v2867_v40, %v794_v62 }
  0xf7   : > { %v896_v6 = vpack.c.bf16 %v859_v5, %v858_v4  ;;  %v846_v4 = vmul.f32 0.2, %v795_v2  ;;  %v796_v5 = vpop.f32.mrf.mxu3 }
  0xf8   : > { %v729_v8 = vpop.f32.mrf.mxu0 }
  0xf9   : > { %2051 = vmatmul.msk.bf16.gmra.mxu1 %vm950_vm2, %v896_v6  ;;  %v730_v9 = vadd.f32 %v2867_v40, %v729_v8  ;;  %v886_v8 = vmax.f32 %v795_v2, %v846_v4 }
  0xfb   : > { %2024 = vmatmul.msk.bf16.gmra.mxu0 %vm640_vm1, %v2342_v7  ;;  %v820_v11 = vmul.f32 0.2, %v730_v9  ;;  %v797_v7 = vadd.f32 %v2867_v40, %v796_v5 }
  0xfd   : > { %v860_v14 = vmax.f32 %v730_v9, %v820_v11  ;;  %v847_v9 = vmul.f32 0.2, %v797_v7 }
 0x100   : > { %v731_v10 = vpop.f32.mrf.mxu0 }
 0x101   : > { %v732_v12 = vadd.f32 %v2867_v40, %v731_v10 }
 0x103   : > { %v821_v13 = vmul.f32 0.2, %v732_v12 }
 0x105   : > { %v861_v15 = vmax.f32 %v732_v12, %v821_v13  ;;  %v887_v13 = vmax.f32 %v797_v7, %v847_v9 }
 0x107   : > { %v897_v16 = vpack.c.bf16 %v861_v15, %v860_v14  ;;  %v910_v15 = vpack.c.bf16 %v887_v13, %v886_v8 }
 0x108   : > { %v734_v18 = vpop.f32.mrf.mxu0 }
 0x109   : > { %2052 = vmatmul.msk.bf16.gmra.mxu1 %vm950_vm2, %v897_v16  ;;  %v735_v19 = vadd.f32 %v2867_v40, %v734_v18  ;;  %v799_v16 = vpop.f32.mrf.mxu3  ;;  %2065 = vmatmul.msk.bf16.gmra.mxu2 %vm950_vm2, %v910_v15 }
 0x10b   : > { %2025 = vmatmul.msk.bf16.gmra.mxu0 %vm640_vm1, %v2343_v17  ;;  %v822_v21 = vmul.f32 0.2, %v735_v19 }
 0x10d   : > { %v862_v25 = vmax.f32 %v735_v19, %v822_v21 }
 0x110   : > { %v736_v20 = vpop.f32.mrf.mxu0 }
 0x111   : > { %v737_v22 = vadd.f32 %v2867_v40, %v736_v20  ;;  %v800_v20 = vadd.f32 %v2867_v40, %v799_v16 }
 0x113   : > { %v823_v23 = vmul.f32 0.2, %v737_v22 }
 0x115   : > { %v863_v26 = vmax.f32 %v737_v22, %v823_v23  ;;  %v848_v22 = vmul.f32 0.2, %v800_v20  ;;  %v801_v23 = vpop.f32.mrf.mxu3 }
 0x117   : > { %v898_v27 = vpack.c.bf16 %v863_v26, %v862_v25  ;;  %v802_v25 = vadd.f32 %v2867_v40, %v801_v23  ;;  %v888_v26 = vmax.f32 %v800_v20, %v848_v22 }
 0x118   : > { %v739_v30 = vpop.f32.mrf.mxu0 }
 0x119   : > { %2053 = vmatmul.msk.bf16.gmra.mxu1 %vm950_vm2, %v898_v27  ;;  %v740_v33 = vadd.f32 %v2867_v40, %v739_v30  ;;  %v849_v27 = vmul.f32 0.2, %v802_v25 }
 0x11b   : > { %2026 = vmatmul.msk.bf16.gmra.mxu0 %vm640_vm1, %v2344_v28  ;;  %v824_v38 = vmul.f32 0.2, %v740_v33  ;;  %v889_v31 = vmax.f32 %v802_v25, %v849_v27 }
 0x11d   : > { %v864_v45 = vmax.f32 %v740_v33, %v824_v38  ;;  %v911_v33 = vpack.c.bf16 %v889_v31, %v888_v26  ;;  %v804_v34 = vpop.f32.mrf.mxu3 }
 0x11f   : > { %2066 = vmatmul.msk.bf16.gmra.mxu2 %vm950_vm2, %v911_v33 }
 0x120   : > { %v741_v37 = vpop.f32.mrf.mxu0 }
 0x121   : > { %v742_v39 = vadd.f32 %v2867_v40, %v741_v37 }
 0x123   : > { %v825_v42 = vmul.f32 0.2, %v742_v39 }
 0x125   : > { %v865_v46 = vmax.f32 %v742_v39, %v825_v42  ;;  %v805_v39 = vadd.f32 %v2867_v40, %v804_v34  ;;  %v806_v43 = vpop.f32.mrf.mxu3 }
 0x127   : > { %v899_v47 = vpack.c.bf16 %v865_v46, %v864_v45  ;;  %v850_v42 = vmul.f32 0.2, %v805_v39  ;;  %v807_v45 = vadd.f32 %v2867_v40, %v806_v43 }
 0x128   : > { %v744_v49 = vpop.f32.mrf.mxu0 }
 0x129   : > { %2054 = vmatmul.msk.bf16.gmra.mxu1 %vm950_vm2, %v899_v47  ;;  %v745_v52 = vadd.f32 %v2867_v40, %v744_v49  ;;  %v890_v47 = vmax.f32 %v805_v39, %v850_v42  ;;  %v851_v48 = vmul.f32 0.2, %v807_v45 }
 0x12b   : > { %v826_v57 = vmul.f32 0.2, %v745_v52 }
 0x12d   : > { %v866_v63 = vmax.f32 %v745_v52, %v826_v57  ;;  %v891_v52 = vmax.f32 %v807_v45, %v851_v48  ;;  %v809_v55 = vpop.f32.mrf.mxu3 }
 0x12f   : > { %v912_v54 = vpack.c.bf16 %v891_v52, %v890_v47 }
 0x130   : > { %v746_v56 = vpop.f32.mrf.mxu0 }
 0x131   : > { %v747_v58 = vadd.f32 %v2867_v40, %v746_v56  ;;  %2067 = vmatmul.msk.bf16.gmra.mxu2 %vm950_vm2, %v912_v54 }
 0x133   : > { %v827_v60 = vmul.f32 0.2, %v747_v58 }
 0x135   : > { %v867_v0 = vmax.f32 %v747_v58, %v827_v60  ;;  %v810_v60 = vadd.f32 %v2867_v40, %v809_v55 }
 0x137   : > { %v900_v1 = vpack.c.bf16 %v867_v0, %v866_v63  ;;  %v852_v62 = vmul.f32 0.2, %v810_v60  ;;  %v811_v63 = vpop.f32.mrf.mxu3 }
 0x138   : > { %v749_v3 = vpop.f32.mrf.mxu0 }
 0x139   : > { %2055 = vmatmul.msk.bf16.gmra.mxu1 %vm950_vm2, %v900_v1  ;;  %v750_v6 = vadd.f32 %v2867_v40, %v749_v3  ;;  %v812_v1 = vadd.f32 %v2867_v40, %v811_v63  ;;  %v2935_v3 = vld [vmem:[%s3542_s4] ss:$0 sm:$0xff]  ;;  %v892_v4 = vmax.f32 %v810_v60, %v852_v62 }
 0x13b   : > { %v828_v11 = vmul.f32 0.2, %v750_v6  ;;  %v853_v5 = vmul.f32 0.2, %v812_v1 }
 0x13d   : > { %v868_v17 = vmax.f32 %v750_v6, %v828_v11  ;;  %v893_v9 = vmax.f32 %v812_v1, %v853_v5 }
 0x140   : > { %v751_v10 = vpop.f32.mrf.mxu0 }
 0x141   : > { %v752_v12 = vadd.f32 %v2867_v40, %v751_v10 }
 0x143   : > { %v829_v14 = vmul.f32 0.2, %v752_v12 }
 0x145   : > { %v869_v18 = vmax.f32 %v752_v12, %v829_v14  ;;  %v913_v12 = vpack.c.bf16 %v893_v9, %v892_v4 }
 0x147   : > { %v901_v19 = vpack.c.bf16 %v869_v18, %v868_v17  ;;  %2068 = vmatmul.msk.bf16.gmra.mxu2 %vm950_vm2, %v913_v12 }
 0x148   : > { %v754_v21 = vpop.f32.mrf.mxu0 }
 0x149   : > { %2056 = vmatmul.msk.bf16.gmra.mxu1 %vm950_vm2, %v901_v19  ;;  %v755_v24 = vadd.f32 %v2867_v40, %v754_v21 }
 0x14b   : > { %v830_v29 = vmul.f32 0.2, %v755_v24 }
 0x14d   : > { %v870_v35 = vmax.f32 %v755_v24, %v830_v29 }
 0x150   : > { %v756_v28 = vpop.f32.mrf.mxu0 }
 0x151   : > { %v757_v30 = vadd.f32 %v2867_v40, %v756_v28 }
 0x153   : > { %v831_v32 = vmul.f32 0.2, %v757_v30 }
 0x155   : > { %v871_v36 = vmax.f32 %v757_v30, %v831_v32 }
 0x156   : > { %v1020_v37 = vpop.f32.mrf.mxu1 }
 0x157   : > { %v902_v38 = vpack.c.bf16 %v871_v36, %v870_v35  ;;  %v1021_v10 = vadd.f32 %v2935_v3, %v1020_v37 }
 0x158   : > { %v759_v41 = vpop.f32.mrf.mxu0 }
 0x159   : > { %2057 = vmatmul.msk.bf16.gmra.mxu1 %vm950_vm2, %v902_v38  ;;  %v760_v44 = vadd.f32 %v2867_v40, %v759_v41  ;;  %v1120_v16 = vmul.f32 0.2, %v1021_v10 }
 0x15b   : > { %v832_v50 = vmul.f32 0.2, %v760_v44  ;;  %v1160_v21 = vmax.f32 %v1021_v10, %v1120_v16 }
 0x15d   : > { %v872_v56 = vmax.f32 %v760_v44, %v832_v50 }
 0x15e   : > { %v1022_v46 = vpop.f32.mrf.mxu1 }
 0x15f   : > { %v1023_v22 = vadd.f32 %v2935_v3, %v1022_v46 }
 0x160   : > { %v761_v49 = vpop.f32.mrf.mxu0 }
 0x161   : > { %v762_v51 = vadd.f32 %v2867_v40, %v761_v49  ;;  %v1121_v27 = vmul.f32 0.2, %v1023_v22 }
 0x163   : > { %v833_v53 = vmul.f32 0.2, %v762_v51  ;;  %v1161_v33 = vmax.f32 %v1023_v22, %v1121_v27 }
 0x165   : > { %v873_v57 = vmax.f32 %v762_v51, %v833_v53 }
 0x166   : > { %v1025_v58 = vpop.f32.mrf.mxu1 }
 0x167   : > { %v903_v59 = vpack.c.bf16 %v873_v57, %v872_v56  ;;  %v1026_v34 = vadd.f32 %v2935_v3, %v1025_v58 }
 0x168   : > { %v764_v61 = vpop.f32.mrf.mxu0 }
 0x169   : > { %2058 = vmatmul.msk.bf16.gmra.mxu1 %vm950_vm2, %v903_v59  ;;  %v765_v0 = vadd.f32 %v2867_v40, %v764_v61  ;;  %v1122_v42 = vmul.f32 0.2, %v1026_v34 }
 0x16b   : > { %v834_v7 = vmul.f32 0.2, %v765_v0  ;;  %v1162_v47 = vmax.f32 %v1026_v34, %v1122_v42 }
 0x16d   : > { %v874_v13 = vmax.f32 %v765_v0, %v834_v7 }
 0x16e   : > { %v1027_v2 = vpop.f32.mrf.mxu1 }
 0x16f   : > { %v1028_v48 = vadd.f32 %v2935_v3, %v1027_v2 }
 0x170   : > { %v766_v6 = vpop.f32.mrf.mxu0 }
 0x171   : > { %v767_v8 = vadd.f32 %v2867_v40, %v766_v6  ;;  %v1123_v53 = vmul.f32 0.2, %v1028_v48 }
 0x173   : > { %v835_v11 = vmul.f32 0.2, %v767_v8  ;;  %v1163_v59 = vmax.f32 %v1028_v48, %v1123_v53 }
 0x175   : > { %v875_v14 = vmax.f32 %v767_v8, %v835_v11 }
 0x176   : > { %v1030_v15 = vpop.f32.mrf.mxu1 }
 0x177   : > { %v1031_v17 = vadd.f32 %v2935_v3, %v1030_v15  ;;  %v904_v18 = vpack.c.bf16 %v875_v14, %v874_v13 }
 0x178   : > { %v769_v19 = vpop.f32.mrf.mxu0 }
 0x179   : > { %v1124_v20 = vmul.f32 0.2, %v1031_v17  ;;  %2059 = vmatmul.msk.bf16.gmra.mxu1 %vm950_vm2, %v904_v18  ;;  %v770_v25 = vadd.f32 %v2867_v40, %v769_v19 }
 0x17b   : > { %v1164_v23 = vmax.f32 %v1031_v17, %v1124_v20  ;;  %v836_v30 = vmul.f32 0.2, %v770_v25 }
 0x17d   : > { %v1200_v24 = vmax.f32 %v1160_v21, %v1164_v23  ;;  %v876_v37 = vmax.f32 %v770_v25, %v836_v30 }
 0x17e   : > { %v1032_v26 = vpop.f32.mrf.mxu1 }
 0x17f   : > { %v1033_v28 = vadd.f32 %v2935_v3, %v1032_v26 }
 0x180   : > { %v771_v29 = vpop.f32.mrf.mxu0 }
 0x181   : > { %v1125_v31 = vmul.f32 0.2, %v1033_v28  ;;  %v772_v32 = vadd.f32 %v2867_v40, %v771_v29 }
 0x183   : > { %v1165_v35 = vmax.f32 %v1033_v28, %v1125_v31  ;;  %v837_v36 = vmul.f32 0.2, %v772_v32 }
 0x185   : > { %v1219_v38 = vmax.f32 %v1161_v33, %v1165_v35  ;;  %v877_v39 = vmax.f32 %v772_v32, %v837_v36 }
 0x186   : > { %v1035_v41 = vpop.f32.mrf.mxu1 }
 0x187   : > { %v1036_v43 = vadd.f32 %v2935_v3, %v1035_v41  ;;  %v905_v44 = vpack.c.bf16 %v877_v39, %v876_v37 }
 0x188   : > { %v774_v45 = vpop.f32.mrf.mxu0 }
 0x189   : > { %v1126_v46 = vmul.f32 0.2, %v1036_v43  ;;  %2060 = vmatmul.msk.bf16.gmra.mxu1 %vm950_vm2, %v905_v44  ;;  %v775_v51 = vadd.f32 %v2867_v40, %v774_v45 }
 0x18b   : > { %v1166_v49 = vmax.f32 %v1036_v43, %v1126_v46  ;;  %v838_v56 = vmul.f32 0.2, %v775_v51 }
 0x18d   : > { %v1201_v50 = vmax.f32 %v1162_v47, %v1166_v49  ;;  %v878_v62 = vmax.f32 %v775_v51, %v838_v56  ;;  %v2295_v49 = vld [vmem:[%s3543_s5 + $0x1c0] sm:$0xf]  ;;  %v2411_v51 = vld [vmem:[%s3543_s5 + $0x1c4] sm:$0xf] }
 0x18e   : > { %v1037_v52 = vpop.f32.mrf.mxu1 }
 0x18f   : > { %v1038_v54 = vadd.f32 %v2935_v3, %v1037_v52 }
 0x190   : > { %v776_v55 = vpop.f32.mrf.mxu0 }
 0x191   : > { %v1127_v57 = vmul.f32 0.2, %v1038_v54  ;;  %v777_v58 = vadd.f32 %v2867_v40, %v776_v55 }
 0x193   : > { %v1167_v60 = vmax.f32 %v1038_v54, %v1127_v57  ;;  %v839_v61 = vmul.f32 0.2, %v777_v58  ;;  %v2297_v54 = vld [vmem:[%s3543_s5 + $0x1e0] sm:$0xf0] }
 0x194   : > { %v2300_v56 = vor.u32 %v2411_v51, %v2297_v54  ;;  %v2103_v51 = vld [vmem:[%s3543_s5 + $0x40] sm:$0xf] }
 0x195   : > { %v1220_v63 = vmax.f32 %v1163_v59, %v1167_v60  ;;  %v879_v0 = vmax.f32 %v777_v58, %v839_v61 }
 0x196   : > { %v1040_v1 = vpop.f32.mrf.mxu1  ;;  %1655 = vmatpush.bf16.msrb.mxu3 %v2300_v56 }
 0x197   : > { %v906_v2 = vpack.c.bf16 %v879_v0, %v878_v62  ;;  %v1041_v4 = vadd.f32 %v2935_v3, %v1040_v1 }
 0x198   : > { %v779_v5 = vpop.f32.mrf.mxu0 }
 0x199   : > { %v1128_v6 = vmul.f32 0.2, %v1041_v4  ;;  %2061 = vmatmul.msk.bf16.gmra.mxu1 %vm950_vm2, %v906_v2  ;;  %v780_v9 = vadd.f32 %v2867_v40, %v779_v5  ;;  %v2263_v2 = vld [vmem:[%s3543_s5 + $0x180] sm:$0xf]  ;;  %v2403_v5 = vld [vmem:[%s3543_s5 + $0x184] sm:$0xf] }
 0x19b   : > { %v1168_v7 = vmax.f32 %v1041_v4, %v1128_v6  ;;  %v840_v13 = vmul.f32 0.2, %v780_v9  ;;  %v2407_v4 = vld [vmem:[%s3543_s5 + $0x19c] sm:$0xf0] }
 0x19d   : > { %v1202_v8 = vmax.f32 %v1200_v24, %v1168_v7  ;;  %v880_v18 = vmax.f32 %v780_v9, %v840_v13  ;;  %v2265_v9 = vld [vmem:[%s3543_s5 + $0x1a0] sm:$0xf0] }
 0x19e   : > { %v1042_v10 = vpop.f32.mrf.mxu1 }
 0x19f   : > { %v1043_v11 = vadd.f32 %v2935_v3, %v1042_v10 }
 0x1a0   : > { %v781_v12 = vpop.f32.mrf.mxu0 }
 0x1a1   : > { %v1129_v14 = vmul.f32 0.2, %v1043_v11  ;;  %v782_v15 = vadd.f32 %v2867_v40, %v781_v12 }
 0x1a3   : > { %v1169_v16 = vmax.f32 %v1043_v11, %v1129_v14  ;;  %v841_v17 = vmul.f32 0.2, %v782_v15  ;;  %v2268_v11 = vor.u32 %v2403_v5, %v2265_v9  ;;  %v2416_v5 = vld [vmem:[%s3543_s5 + $0x1e4] sm:$0xf0] }
 0x1a5   : > { %v1221_v19 = vmax.f32 %v1219_v38, %v1169_v16  ;;  %v881_v20 = vmax.f32 %v782_v15, %v841_v17  ;;  %v2963_v38 = vpop.f32.mrf.mxu2  ;;  %1656 = vmatpush.bf16.msrb.mxu3 %v2268_v11  ;;  %v2231_v15 = vld [vmem:[%s3543_s5 + $0x140] sm:$0xf]  ;;  %v2395_v17 = vld [vmem:[%s3543_s5 + $0x144] sm:$0xf]  ;;  %v2271_v11 = vld [vmem:[%s3543_s5 + $0x188] sm:$0xf] }
 0x1a6   : > { %v1045_v21 = vpop.f32.mrf.mxu1  ;;  %v2399_v16 = vld [vmem:[%s3543_s5 + $0x15c] sm:$0xf0] }
 0x1a7   : > { %v907_v22 = vpack.c.bf16 %v881_v20, %v880_v18  ;;  %v1046_v23 = vadd.f32 %v2935_v3, %v1045_v21  ;;  %v2233_v20 = vld [vmem:[%s3543_s5 + $0x160] sm:$0xf0] }
 0x1a9   : > { %v1130_v24 = vmul.f32 0.2, %v1046_v23  ;;  %2062 = vmatmul.msk.bf16.gmra.mxu1 %vm950_vm2, %v907_v22  ;;  %v2236_v22 = vor.u32 %v2395_v17, %v2233_v20  ;;  %v2239_v20 = vld [vmem:[%s3543_s5 + $0x148] sm:$0xf] }
 0x1ab   : > { %v1170_v25 = vmax.f32 %v1046_v23, %v1130_v24  ;;  %1657 = vmatpush.bf16.msrb.mxu3 %v2236_v22 }
 0x1ad   : > { %v1203_v26 = vmax.f32 %v1201_v50, %v1170_v25  ;;  %v2966_v46 = vpop.f32.mrf.mxu2  ;;  %v2415_v50 = vld [vmem:[%s3543_s5 + $0x1dc] sm:$0xf0] }
 0x1ae   : > { %v1047_v27 = vpop.f32.mrf.mxu1  ;;  %v2296_v53 = vor.u32 %v2415_v50, %v2295_v49 }
 0x1af   : > { %v1048_v28 = vadd.f32 %v2935_v3, %v1047_v27 }
 0x1b0   : > { %1641 = vmatpush.bf16.msrb.mxu2 %v2296_v53  ;;  %v2363_v53 = vld [vmem:[%s3543_s5 + $0x44] sm:$0xf] }
 0x1b1   : > { %v1131_v29 = vmul.f32 0.2, %v1048_v28 }
 0x1b3   : > { %v1171_v30 = vmax.f32 %v1048_v28, %v1131_v29  ;;  %v2199_v28 = vld [vmem:[%s3543_s5 + $0x100] sm:$0xf] }
 0x1b4   : > { %v2391_v29 = vld [vmem:[%s3543_s5 + $0x11c] sm:$0xf0] }
 0x1b5   : > { %v1222_v40 = vmax.f32 %v1220_v63, %v1171_v30  ;;  %v2981_v59 = vpop.f32.mrf.mxu2  ;;  %v2387_v30 = vld [vmem:[%s3543_s5 + $0x104] sm:$0xf] }
 0x1b6   : > { %v1050_v31 = vpop.f32.mrf.mxu1 }
 0x1b7   : > { %v1051_v32 = vadd.f32 %v2935_v3, %v1050_v31  ;;  %v2201_v31 = vld [vmem:[%s3543_s5 + $0x120] sm:$0xf0] }
 0x1b9   : > { %v1132_v33 = vmul.f32 0.2, %v1051_v32 }
 0x1bb   : > { %v1172_v34 = vmax.f32 %v1051_v32, %v1132_v33  ;;  %v2204_v33 = vor.u32 %v2387_v30, %v2201_v31  ;;  %v2392_v30 = vld [vmem:[%s3543_s5 + $0x124] sm:$0xf0] }
 0x1bd   : > { %v1204_v35 = vmax.f32 %v1202_v8, %v1172_v34  ;;  %v2997_v7 = vpop.f32.mrf.mxu2  ;;  %v2264_v8 = vor.u32 %v2407_v4, %v2263_v2  ;;  %1658 = vmatpush.bf16.msrb.mxu3 %v2204_v33  ;;  %v2167_v34 = vld [vmem:[%s3543_s5 + $0xc0] sm:$0xf]  ;;  %v2303_v2 = vld [vmem:[%s3543_s5 + $0x1c8] sm:$0xf] }
 0x1be   : > { %v1052_v36 = vpop.f32.mrf.mxu1  ;;  %v2304_v9 = vor.u32 %v2416_v5, %v2303_v2 }
 0x1bf   : > { %v1053_v37 = vadd.f32 %v2935_v3, %v1052_v36  ;;  %1642 = vmatpush.bf16.msrb.mxu2 %v2264_v8  ;;  %v2379_v36 = vld [vmem:[%s3543_s5 + $0xc4] sm:$0xf]  ;;  %v2305_v8 = vld [vmem:[%s3543_s5 + $0x1e8] sm:$0xf0] }
 0x1c1   : > { %v1133_v39 = vmul.f32 0.2, %v1053_v37 }
 0x1c3   : > { %v1173_v41 = vmax.f32 %v1053_v37, %v1133_v39  ;;  %v2169_v39 = vld [vmem:[%s3543_s5 + $0xe0] sm:$0xf0] }
 0x1c5   : > { %v1223_v42 = vmax.f32 %v1221_v19, %v1173_v41  ;;  %v2232_v19 = vor.u32 %v2399_v16, %v2231_v15  ;;  %v3018_v23 = vpop.f32.mrf.mxu2 }
 0x1c6   : > { %v1055_v43 = vpop.f32.mrf.mxu1 }
 0x1c7   : > { %v1056_v44 = vadd.f32 %v2935_v3, %v1055_v43  ;;  %1643 = vmatpush.bf16.msrb.mxu2 %v2232_v19  ;;  %v2135_v43 = vld [vmem:[%s3543_s5 + $0x80] sm:$0xf] }
 0x1c9   : > { %v1134_v45 = vmul.f32 0.2, %v1056_v44 }
 0x1cb   : > { %v1174_v47 = vmax.f32 %v1056_v44, %v1134_v45  ;;  %v2375_v44 = vld [vmem:[%s3543_s5 + $0x9c] sm:$0xf0]  ;;  %v2371_v45 = vld [vmem:[%s3543_s5 + $0x84] sm:$0xf] }
 0x1cd   : > { %v1205_v48 = vmax.f32 %v1203_v26, %v1174_v47  ;;  %v3036_v32 = vpop.f32.mrf.mxu2  ;;  %v2136_v47 = vor.u32 %v2375_v44, %v2135_v43  ;;  %v2380_v44 = vld [vmem:[%s3543_s5 + $0xcc] sm:$0xf] }
 0x1ce   : > { %v1057_v52 = vpop.f32.mrf.mxu1 }
 0x1cf   : > { %v1058_v55 = vadd.f32 %v2935_v3, %v1057_v52  ;;  %v2367_v52 = vld [vmem:[%s3543_s5 + $0x5c] sm:$0xf0] }
 0x1d0   : > { %v2104_v54 = vor.u32 %v2367_v52, %v2103_v51  ;;  %v2376_v51 = vld [vmem:[%s3543_s5 + $0xa4] sm:$0xf0]  ;;  %v2372_v52 = vld [vmem:[%s3543_s5 + $0x8c] sm:$0xf] }
 0x1d1   : > { %v1135_v57 = vmul.f32 0.2, %v1058_v55 }
 0x1d3   : > { %v1175_v58 = vmax.f32 %v1058_v55, %v1135_v57  ;;  %v2105_v55 = vld [vmem:[%s3543_s5 + $0x60] sm:$0xf0] }
 0x1d4   : > { %v2108_v57 = vor.u32 %v2363_v53, %v2105_v55 }
 0x1d5   : > { %v2983_v60 = vmax.f32 %v1222_v40, %v1175_v58  ;;  %v2200_v40 = vor.u32 %v2391_v29, %v2199_v28  ;;  %v3062_v50 = vpop.f32.mrf.mxu2  ;;  %v2071_v58 = vld [vmem:[%s3543_s5] sm:$0xf]  ;;  %v2207_v29 = vld [vmem:[%s3543_s5 + $0x108] sm:$0xf] }
 0x1d6   : > { %v1060_v61 = vpop.f32.mrf.mxu1  ;;  %v2208_v33 = vor.u32 %v2392_v30, %v2207_v29 }
 0x1d7   : > { %v1061_v62 = vadd.f32 %v2935_v3, %v1060_v61  ;;  %1644 = vmatpush.bf16.msrb.mxu2 %v2200_v40  ;;  %v2359_v61 = vld [vmem:[%s3543_s5 + $0x1c] sm:$0xf0]  ;;  %v2388_v40 = vld [vmem:[%s3543_s5 + $0x10c] sm:$0xf] }
 0x1d9   : > { %v1136_v63 = vmul.f32 0.2, %v1061_v62 }
 0x1db   : > { %v1176_v0 = vmax.f32 %v1061_v62, %v1136_v63  ;;  %v2355_v62 = vld [vmem:[%s3543_s5 + $0x4] sm:$0xf]  ;;  %v2072_v63 = vor.u32 %v2359_v61, %v2071_v58 }
 0x1dd   : > { %v2986_v1 = vmax.f32 %v1204_v35, %v1176_v0  ;;  %v2383_v35 = vld [vmem:[%s3543_s5 + $0xdc] sm:$0xf0]  ;;  %v2073_v0 = vld [vmem:[%s3543_s5 + $0x20] sm:$0xf0]  ;;  %v3109_v15 = vpop.f32.mrf.mxu2 }
 0x1de   : > { %v1062_v6 = vpop.f32.mrf.mxu1  ;;  %v2168_v37 = vor.u32 %v2383_v35, %v2167_v34  ;;  %v2076_v4 = vor.u32 %v2355_v62, %v2073_v0  ;;  %v2209_v34 = vld [vmem:[%s3543_s5 + $0x128] sm:$0xf0]  ;;  %v2111_v0 = vld [vmem:[%s3543_s5 + $0x48] sm:$0xf] }
 0x1df   : > { %v1063_v10 = vadd.f32 %v2935_v3, %v1062_v6  ;;  %v2412_v6 = vld [vmem:[%s3543_s5 + $0x1cc] sm:$0xf] }
 0x1e0   : > { %1645 = vmatpush.bf16.msrb.mxu2 %v2168_v37 }
 0x1e1   : > { %v1137_v12 = vmul.f32 0.2, %v1063_v10 }
 0x1e3   : > { %v1177_v13 = vmax.f32 %v1063_v10, %v1137_v12  ;;  %v2308_v10 = vor.u32 %v2412_v6, %v2305_v8  ;;  %v2408_v12 = vld [vmem:[%s3543_s5 + $0x1a4] sm:$0xf0]  ;;  %v2364_v6 = vld [vmem:[%s3543_s5 + $0x4c] sm:$0xf] }
 0x1e4   : > { %1646 = vmatpush.bf16.msrb.mxu2 %v2136_v47  ;;  %v2272_v17 = vor.u32 %v2408_v12, %v2271_v11  ;;  %v2113_v8 = vld [vmem:[%s3543_s5 + $0x68] sm:$0xf0] }
 0x1e5   : > { %v3003_v14 = vmax.f32 %v1223_v42, %v1177_v13  ;;  %v2172_v42 = vor.u32 %v2379_v36, %v2169_v39  ;;  %v2404_v13 = vld [vmem:[%s3543_s5 + $0x18c] sm:$0xf]  ;;  %v2212_v36 = vor.u32 %v2388_v40, %v2209_v34  ;;  %v3143_v37 = vpop.f32.mrf.mxu2  ;;  %v2175_v39 = vld [vmem:[%s3543_s5 + $0xc8] sm:$0xf]  ;;  %v2116_v11 = vor.u32 %v2364_v6, %v2113_v8 }
 0x1e6   : > { %v1065_v18 = vpop.f32.mrf.mxu1 }
 0x1e7   : > { %v1066_v21 = vadd.f32 %v2935_v3, %v1065_v18  ;;  %1659 = vmatpush.bf16.msrb.mxu3 %v2172_v42  ;;  %v2273_v18 = vld [vmem:[%s3543_s5 + $0x1a8] sm:$0xf0]  ;;  %v2384_v42 = vld [vmem:[%s3543_s5 + $0xe4] sm:$0xf0] }
 0x1e8   : > { %1647 = vmatpush.bf16.msrb.mxu2 %v2104_v54  ;;  %v2276_v19 = vor.u32 %v2404_v13, %v2273_v18  ;;  %v2176_v43 = vor.u32 %v2384_v42, %v2175_v39  ;;  %v1093_v13 = vadd.f32 %v2935_v3, %v2966_v46  ;;  %v2079_v18 = vld [vmem:[%s3543_s5 + $0x8] sm:$0xf]  ;;  %v2081_v46 = vld [vmem:[%s3543_s5 + $0x28] sm:$0xf0] }
 0x1e9   : > { %v1138_v24 = vmul.f32 0.2, %v1066_v21 }
 0x1ea   : > { %v1149_v30 = vmul.f32 0.2, %v1093_v13 }
 0x1eb   : > { %v1178_v25 = vmax.f32 %v1066_v21, %v1138_v24  ;;  %v2400_v21 = vld [vmem:[%s3543_s5 + $0x164] sm:$0xf0]  ;;  %v2396_v24 = vld [vmem:[%s3543_s5 + $0x14c] sm:$0xf] }
 0x1ec   : > { %1648 = vmatpush.bf16.msrb.mxu2 %v2072_v63  ;;  %v2240_v22 = vor.u32 %v2400_v21, %v2239_v20  ;;  %v1189_v42 = vmax.f32 %v1093_v13, %v1149_v30 }
 0x1ed   : > { %v3020_v26 = vmax.f32 %v1205_v48, %v1178_v25  ;;  %v2137_v48 = vld [vmem:[%s3543_s5 + $0xa0] sm:$0xf0]  ;;  %v2241_v25 = vld [vmem:[%s3543_s5 + $0x168] sm:$0xf0] }
 0x1ee   : > { %v3022_v27 = vpop.f32.mrf.mxu1  ;;  %v2140_v49 = vor.u32 %v2371_v45, %v2137_v48  ;;  %v2244_v28 = vor.u32 %v2396_v24, %v2241_v25  ;;  %v1091_v48 = vadd.f32 %v2935_v3, %v2963_v38  ;;  %v2145_v38 = vld [vmem:[%s3543_s5 + $0xa8] sm:$0xf0] }
 0x1ef   : > { %v2148_v61 = vor.u32 %v2372_v52, %v2145_v38 }
 0x1f0   : > { %1660 = vmatpush.bf16.msrb.mxu3 %v2140_v49  ;;  %1669 = vmatpush.bf16.msra.mxu2 %v2304_v9  ;;  %v2143_v49 = vld [vmem:[%s3543_s5 + $0x88] sm:$0xf]  ;;  %v1148_v62 = vmul.f32 0.2, %v1091_v48 }
 0x1f1   : > { %v2144_v55 = vor.u32 %v2376_v51, %v2143_v49  ;;  %v1111_v51 = vadd.f32 %v2935_v3, %v3143_v37 }
 0x1f2   : > { %v1188_v12 = vmax.f32 %v1091_v48, %v1148_v62 }
 0x1f4   : > { %1661 = vmatpush.bf16.msrb.mxu3 %v2108_v57  ;;  %1670 = vmatpush.bf16.msra.mxu2 %v2272_v17 }
 0x1f6   : > { %v1070_v41 = vpop.f32.mrf.mxu1 }
 0x1f7   : > { %v1071_v35 = vadd.f32 %v2935_v3, %v1070_v41  ;;  %v2177_v41 = vld [vmem:[%s3543_s5 + $0xe8] sm:$0xf0] }
 0x1f8   : > { %1662 = vmatpush.bf16.msrb.mxu3 %v2076_v4  ;;  %1671 = vmatpush.bf16.msra.mxu2 %v2240_v22  ;;  %v2180_v47 = vor.u32 %v2380_v44, %v2177_v41  ;;  %v3179_v4 = vpop.f32.mrf.mxu2  ;;  %v1106_v41 = vadd.f32 %v2935_v3, %v3062_v50  ;;  %v1098_v50 = vadd.f32 %v2935_v3, %v2997_v7 }
 0x1f9   : > { %v1140_v45 = vmul.f32 0.2, %v1071_v35  ;;  %v1113_v13 = vadd.f32 %v2935_v3, %v3179_v4 }
 0x1fb   : > { %v1180_v57 = vmax.f32 %v1071_v35, %v1140_v45 }
 0x1fc   : > { %1683 = vmatpush.bf16.msra.mxu3 %v2308_v10  ;;  %1672 = vmatpush.bf16.msra.mxu2 %v2208_v33 }
 0x1fd   : > { %v1208_v9 = vmax.f32 %v2986_v1, %v1180_v57  ;;  %v2356_v1 = vld [vmem:[%s3543_s5 + $0xc] sm:$0xf] }
 0x1fe   : > { %v1072_v56 = vpop.f32.mrf.mxu1  ;;  %v2084_v29 = vor.u32 %v2356_v1, %v2081_v46 }
 0x1ff   : > { %v1073_v53 = vadd.f32 %v2935_v3, %v1072_v56  ;;  %v2368_v56 = vld [vmem:[%s3543_s5 + $0x64] sm:$0xf0] }
 0x200   : > { %1684 = vmatpush.bf16.msra.mxu3 %v2276_v19  ;;  %1673 = vmatpush.bf16.msra.mxu2 %v2176_v43  ;;  %v2112_v5 = vor.u32 %v2368_v56, %v2111_v0  ;;  %v2360_v19 = vld [vmem:[%s3543_s5 + $0x24] sm:$0xf0]  ;;  %v1115_v39 = vpop.f32.mrf.mxu2  ;;  %v1101_v43 = vadd.f32 %v2935_v3, %v3018_v23  ;;  %v1151_v56 = vmul.f32 0.2, %v1098_v50 }
 0x201   : > { %v1141_v2 = vmul.f32 0.2, %v1073_v53  ;;  %v2080_v22 = vor.u32 %v2360_v19, %v2079_v18  ;;  %v1116_v23 = vadd.f32 %v2935_v3, %v1115_v39 }
 0x202   : > { %v1152_v52 = vmul.f32 0.2, %v1101_v43 }
 0x203   : > { %v1181_v20 = vmax.f32 %v1073_v53, %v1141_v2 }
 0x204   : > { %1685 = vmatpush.bf16.msra.mxu3 %v2244_v28  ;;  %1674 = vmatpush.bf16.msra.mxu2 %v2144_v55  ;;  %v1192_v37 = vmax.f32 %v1101_v43, %v1152_v52  ;;  %v2413_v43 = vld [vmem:[%s3543_s5 + $0x1d4] sm:$0xf] }
 0x205   : > { %v1227_v33 = vmax.f32 %v3003_v14, %v1181_v20 }
 0x206   : > { %v3111_v16 = vpop.f32.mrf.mxu1 }
 0x207   : > { %v1076_v24 = vadd.f32 %v2935_v3, %v3111_v16  ;;  %v1096_v16 = vadd.f32 %v2935_v3, %v2981_v59 }
 0x208   : > { %1686 = vmatpush.bf16.msra.mxu3 %v2212_v36  ;;  %1675 = vmatpush.bf16.msra.mxu2 %v2112_v5  ;;  %v1068_v36 = vadd.f32 %v2935_v3, %v3022_v27  ;;  %v1108_v5 = vadd.f32 %v2935_v3, %v3109_v15  ;;  %v1117_v7 = vpop.f32.mrf.mxu2 }
 0x209   : > { %v1142_v34 = vmul.f32 0.2, %v1076_v24  ;;  %v1150_v59 = vmul.f32 0.2, %v1096_v16  ;;  %v1118_v18 = vadd.f32 %v2935_v3, %v1117_v7 }
 0x20a   : > { %v1139_v49 = vmul.f32 0.2, %v1068_v36  ;;  %v1155_v15 = vmul.f32 0.2, %v1108_v5 }
 0x20b   : > { %v1190_v62 = vmax.f32 %v1096_v16, %v1150_v59  ;;  %v2417_v16 = vld [vmem:[%s3543_s5 + $0x1ec] sm:$0xf0] }
 0x20c   : > { %1687 = vmatpush.bf16.msra.mxu3 %v2180_v47  ;;  %1676 = vmatpush.bf16.msra.mxu2 %v2080_v22  ;;  %v1182_v47 = vmax.f32 %v1076_v24, %v1142_v34  ;;  %v1179_v57 = vmax.f32 %v1068_v36, %v1139_v49  ;;  %v1191_v24 = vmax.f32 %v1098_v50, %v1151_v56  ;;  %v2405_v49 = vld [vmem:[%s3543_s5 + $0x194] sm:$0xf] }
 0x20d   : > { %v2397_v50 = vld [vmem:[%s3543_s5 + $0x154] sm:$0xf] }
 0x20e   : > { %v3137_v31 = vpop.f32.mrf.mxu1  ;;  %v1209_v55 = vmax.f32 %v3020_v26, %v1182_v47  ;;  %v2381_v56 = vld [vmem:[%s3543_s5 + $0xd4] sm:$0xf] }
 0x20f   : > { %v1078_v14 = vadd.f32 %v2935_v3, %v3137_v31 }
 0x210   : > { %1688 = vmatpush.bf16.msra.mxu3 %v2148_v61  ;;  %v1156_v61 = vmul.f32 0.2, %v1111_v51 }
 0x211   : > { %v1143_v38 = vmul.f32 0.2, %v1078_v14 }
 0x213   : > { %v1183_v8 = vmax.f32 %v1078_v14, %v1143_v38  ;;  %v2279_v14 = vld [vmem:[%s3543_s5 + $0x190] sm:$0xf] }
 0x214   : > { %1689 = vmatpush.bf16.msra.mxu3 %v2116_v11  ;;  %v1226_v11 = vmax.f32 %v2983_v60, %v1179_v57  ;;  %v2393_v57 = vld [vmem:[%s3543_s5 + $0x12c] sm:$0xf0] }
 0x216   : > { %v1080_v54 = vpop.f32.mrf.mxu1  ;;  %v1228_v20 = vmax.f32 %v1226_v11, %v1183_v8  ;;  %v2377_v8 = vld [vmem:[%s3543_s5 + $0xac] sm:$0xf0] }
 0x217   : > { %v1081_v58 = vadd.f32 %v2935_v3, %v1080_v54  ;;  %v1154_v54 = vmul.f32 0.2, %v1106_v41 }
 0x218   : > { %1690 = vmatpush.bf16.msra.mxu3 %v2084_v29  ;;  %v1159_v29 = vmul.f32 0.2, %v1118_v18 }
 0x219   : > { %v1144_v63 = vmul.f32 0.2, %v1081_v58  ;;  %v1194_v2 = vmax.f32 %v1106_v41, %v1154_v54  ;;  %v2249_v54 = vld [vmem:[%s3543_s5 + $0x170] sm:$0xf0] }
 0x21a   : > { %v2252_v38 = vor.u32 %v2397_v50, %v2249_v54  ;;  %v2159_v54 = vld [vmem:[%s3543_s5 + $0x98] sm:$0xf] }
 0x21b   : > { %v1184_v10 = vmax.f32 %v1081_v58, %v1144_v63  ;;  %v1103_v58 = vadd.f32 %v2935_v3, %v3036_v32  ;;  %v1158_v63 = vmul.f32 0.2, %v1116_v23 }
 0x21d   : > { %v1210_v17 = vmax.f32 %v1208_v9, %v1184_v10  ;;  %v1153_v32 = vmul.f32 0.2, %v1103_v58 }
 0x21e   : > { %v1082_v21 = vpop.f32.mrf.mxu1 }
 0x21f   : > { %v1212_v25 = vmax.f32 %v1210_v17, %v1188_v12  ;;  %v1083_v28 = vadd.f32 %v2935_v3, %v1082_v21  ;;  %v1196_v12 = vmax.f32 %v1111_v51, %v1156_v61  ;;  %v1198_v17 = vmax.f32 %v1116_v23, %v1158_v63  ;;  %v2281_v51 = vld [vmem:[%s3543_s5 + $0x1b0] sm:$0xf0]  ;;  %v2247_v23 = vld [vmem:[%s3543_s5 + $0x150] sm:$0xf] }
 0x220   : > { %v2284_v52 = vor.u32 %v2405_v49, %v2281_v51  ;;  %v2217_v61 = vld [vmem:[%s3543_s5 + $0x130] sm:$0xf0]  ;;  %v2183_v63 = vld [vmem:[%s3543_s5 + $0xd0] sm:$0xf]  ;;  %v2191_v51 = vld [vmem:[%s3543_s5 + $0xd8] sm:$0xf] }
 0x221   : > { %v1145_v40 = vmul.f32 0.2, %v1083_v28  ;;  %v1214_v26 = vmax.f32 %v1212_v25, %v1192_v37  ;;  %v1193_v25 = vmax.f32 %v1103_v58, %v1153_v32  ;;  %v2389_v58 = vld [vmem:[%s3543_s5 + $0x114] sm:$0xf]  ;;  %v2119_v32 = vld [vmem:[%s3543_s5 + $0x50] sm:$0xf] }
 0x222   : > { %v2220_v37 = vor.u32 %v2389_v58, %v2217_v61  ;;  %v2127_v61 = vld [vmem:[%s3543_s5 + $0x58] sm:$0xf] }
 0x223   : > { %v1185_v35 = vmax.f32 %v1083_v28, %v1145_v40  ;;  %v1216_v21 = vmax.f32 %v1214_v26, %v1196_v12  ;;  %v1157_v28 = vmul.f32 0.2, %v1113_v13  ;;  %v1195_v40 = vmax.f32 %v1108_v5, %v1155_v15  ;;  %v2373_v26 = vld [vmem:[%s3543_s5 + $0x94] sm:$0xf]  ;;  %v2369_v12 = vld [vmem:[%s3543_s5 + $0x6c] sm:$0xf0] }
 0x224   : > { %v2361_v15 = vld [vmem:[%s3543_s5 + $0x2c] sm:$0xf0] }
 0x225   : > { %v1229_v44 = vmax.f32 %v1227_v33, %v1185_v35  ;;  %v1197_v4 = vmax.f32 %v1113_v13, %v1157_v28  ;;  %v1199_v35 = vmax.f32 %v1118_v18, %v1159_v29  ;;  %v2365_v13 = vld [vmem:[%s3543_s5 + $0x54] sm:$0xf]  ;;  %v2120_v18 = vor.u32 %v2369_v12, %v2119_v32 }
 0x226   : > { %v1085_v45 = vpop.f32.mrf.mxu1 }
 0x227   : > { %v1231_v48 = vmax.f32 %v1229_v44, %v1189_v42  ;;  %v1086_v27 = vadd.f32 %v2935_v3, %v1085_v45  ;;  %v2313_v44 = vld [vmem:[%s3543_s5 + $0x1f0] sm:$0xf0] }
 0x228   : > { %v2316_v47 = vor.u32 %v2413_v43, %v2313_v44 }
 0x229   : > { %v1146_v53 = vmul.f32 0.2, %v1086_v27  ;;  %v1233_v33 = vmax.f32 %v1231_v48, %v1193_v25  ;;  %v2321_v25 = vld [vmem:[%s3543_s5 + $0x1f8] sm:$0xf0] }
 0x22b   : > { %v1186_v31 = vmax.f32 %v1086_v27, %v1146_v53  ;;  %v1235_v39 = vmax.f32 %v1233_v33, %v1197_v4  ;;  %v2409_v27 = vld [vmem:[%s3543_s5 + $0x1ac] sm:$0xf0]  ;;  %v2410_v33 = vld [vmem:[%s3543_s5 + $0x1b4] sm:$0xf0]  ;;  %v2289_v4 = vld [vmem:[%s3543_s5 + $0x1b8] sm:$0xf0] }
 0x22c   : > { %v2280_v59 = vor.u32 %v2409_v27, %v2279_v14  ;;  %v2401_v53 = vld [vmem:[%s3543_s5 + $0x16c] sm:$0xf0]  ;;  %v2225_v14 = vld [vmem:[%s3543_s5 + $0x138] sm:$0xf0] }
 0x22d   : > { %v1211_v0 = vmax.f32 %v1209_v55, %v1186_v31  ;;  %v2248_v55 = vor.u32 %v2401_v53, %v2247_v23  ;;  %v2215_v31 = vld [vmem:[%s3543_s5 + $0x110] sm:$0xf]  ;;  %v2193_v23 = vld [vmem:[%s3543_s5 + $0xf8] sm:$0xf0] }
 0x22e   : > { %v1087_v6 = vpop.f32.mrf.mxu1 }
 0x22f   : > { %v1213_v9 = vmax.f32 %v1211_v0, %v1190_v62  ;;  %v1088_v10 = vadd.f32 %v2935_v3, %v1087_v6  ;;  %v2311_v3 = vld [vmem:[%s3543_s5 + $0x1d0] sm:$0xf]  ;;  %v2216_v62 = vor.u32 %v2393_v57, %v2215_v31  ;;  %v2161_v31 = vld [vmem:[%s3543_s5 + $0xb8] sm:$0xf0] }
 0x230   : > { %v2312_v45 = vor.u32 %v2417_v16, %v2311_v3  ;;  %v2385_v0 = vld [vmem:[%s3543_s5 + $0xec] sm:$0xf0]  ;;  %v2255_v3 = vld [vmem:[%s3543_s5 + $0x158] sm:$0xf]  ;;  %v2257_v16 = vld [vmem:[%s3543_s5 + $0x178] sm:$0xf0] }
 0x231   : > { %v1215_v19 = vmax.f32 %v1213_v9, %v1194_v2  ;;  %v1147_v1 = vmul.f32 0.2, %v1088_v10  ;;  %v2185_v2 = vld [vmem:[%s3543_s5 + $0xf0] sm:$0xf0]  ;;  %v2184_v5 = vor.u32 %v2385_v0, %v2183_v63  ;;  %v2151_v6 = vld [vmem:[%s3543_s5 + $0x90] sm:$0xf] }
 0x232   : > { %v2188_v7 = vor.u32 %v2381_v56, %v2185_v2  ;;  %v2153_v9 = vld [vmem:[%s3543_s5 + $0xb0] sm:$0xf0]  ;;  %v2129_v63 = vld [vmem:[%s3543_s5 + $0x78] sm:$0xf0]  ;;  %v2095_v2 = vld [vmem:[%s3543_s5 + $0x18] sm:$0xf] }
 0x233   : > { %v1217_v22 = vmax.f32 %v1215_v19, %v1198_v17  ;;  %v1187_v46 = vmax.f32 %v1088_v10, %v1147_v1  ;;  %v2152_v10 = vor.u32 %v2377_v8, %v2151_v6  ;;  %v2156_v11 = vor.u32 %v2373_v26, %v2153_v9  ;;  %v2121_v17 = vld [vmem:[%s3543_s5 + $0x70] sm:$0xf0]  ;;  %v2087_v1 = vld [vmem:[%s3543_s5 + $0x10] sm:$0xf]  ;;  %v2097_v6 = vld [vmem:[%s3543_s5 + $0x38] sm:$0xf0] }
 0x234   : > { %v2124_v19 = vor.u32 %v2365_v13, %v2121_v17  ;;  %v2088_v28 = vor.u32 %v2361_v15, %v2087_v1  ;;  %v3437_v9 = vld [vmem:[%s3544_s6] sm:$0xff] }
 0x235   : > { %v1218_v60 = vmax.f32 %v1216_v21, %v1217_v22  ;;  %v1230_v30 = vmax.f32 %v1228_v20, %v1187_v46  ;;  %v2357_v20 = vld [vmem:[%s3543_s5 + $0x14] sm:$0xf]  ;;  %v2319_v22 = vld [vmem:[%s3543_s5 + $0x1d8] sm:$0xf]  ;;  %v1305_v32 = vperm.slane %v3437_v9, 0  ;;  %v1306_v12 = vperm.slane %v3437_v9, 1 }
 0x236   : > { %v2089_v21 = vld [vmem:[%s3543_s5 + $0x30] sm:$0xf0]  ;;  %v2418_v46 = vld [vmem:[%s3543_s5 + $0x1f4] sm:$0xf0] }
 0x237   : > { %v1232_v34 = vmax.f32 %v1230_v30, %v1191_v24  ;;  %v2414_v24 = vld [vmem:[%s3543_s5 + $0x1dc] sm:$0xf]  ;;  %v2092_v29 = vor.u32 %v2357_v20, %v2089_v21 }
 0x238   : > { %v2324_v30 = vor.u32 %v2414_v24, %v2321_v25 }
 0x239   : > { %v1234_v36 = vmax.f32 %v1232_v34, %v1195_v40  ;;  %v2287_v40 = vld [vmem:[%s3543_s5 + $0x198] sm:$0xf]  ;;  %v2406_v34 = vld [vmem:[%s3543_s5 + $0x19c] sm:$0xf] }
 0x23b   : > { %v1236_v42 = vmax.f32 %v1234_v36, %v1199_v35  ;;  %v2288_v35 = vor.u32 %v2410_v33, %v2287_v40  ;;  %v2292_v36 = vor.u32 %v2406_v34, %v2289_v4  ;;  %v1307_v33 = vperm.slane %v3437_v9, 2 }
 0x23c   : > { %v1308_v34 = vperm.slane %v3437_v9, 3 }
 0x23d   : > { %v1237_v41 = vmax.f32 %v1235_v39, %v1236_v42  ;;  %v2402_v39 = vld [vmem:[%s3543_s5 + $0x174] sm:$0xf0]  ;;  %v2398_v42 = vld [vmem:[%s3543_s5 + $0x15c] sm:$0xf] }
 0x23e   : > { %v2256_v43 = vor.u32 %v2402_v39, %v2255_v3  ;;  %v2260_v44 = vor.u32 %v2398_v42, %v2257_v16 }
 0x23f   : > { %v3247_v48 = vpack.c.bf16 %v1237_v41, %v1218_v60  ;;  %v2320_v60 = vor.u32 %v2418_v46, %v2319_v22  ;;  %v2223_v41 = vld [vmem:[%s3543_s5 + $0x118] sm:$0xf] }
 0x241   : > { %1649 = vmatmul.bf16.vlgmr.msrb.gmra.mxu2 %v3247_v48  ;;  %1663 = vmatmul.bf16.vlgmr.msrb.gmra.mxu3 %v3247_v48 }
 0x242   : > { %1697 = vmatpush.bf16.msrb.mxu2 %v2312_v45  ;;  %1711 = vmatpush.bf16.msrb.mxu3 %v2316_v47  ;;  %v2394_v45 = vld [vmem:[%s3543_s5 + $0x134] sm:$0xf0]  ;;  %v2390_v47 = vld [vmem:[%s3543_s5 + $0x11c] sm:$0xf] }
 0x243   : > { %v2224_v27 = vor.u32 %v2394_v45, %v2223_v41  ;;  %v2228_v49 = vor.u32 %v2390_v47, %v2225_v14 }
 0x246   : > { %1698 = vmatpush.bf16.msrb.mxu2 %v2280_v59  ;;  %1712 = vmatpush.bf16.msrb.mxu3 %v2284_v52  ;;  %v2386_v59 = vld [vmem:[%s3543_s5 + $0xf4] sm:$0xf0]  ;;  %v2382_v52 = vld [vmem:[%s3543_s5 + $0xdc] sm:$0xf] }
 0x247   : > { %v2192_v53 = vor.u32 %v2386_v59, %v2191_v51  ;;  %v2196_v50 = vor.u32 %v2382_v52, %v2193_v23  ;;  %v1309_v23 = vperm.slane %v3437_v9, 4 }
 0x24a   : > { %1699 = vmatpush.bf16.msrb.mxu2 %v2248_v55  ;;  %1713 = vmatpush.bf16.msrb.mxu3 %v2252_v38  ;;  %v2378_v55 = vld [vmem:[%s3543_s5 + $0xb4] sm:$0xf0]  ;;  %v2374_v38 = vld [vmem:[%s3543_s5 + $0x9c] sm:$0xf] }
 0x24b   : > { %v2160_v57 = vor.u32 %v2378_v55, %v2159_v54  ;;  %v2164_v58 = vor.u32 %v2374_v38, %v2161_v31 }
 0x24e   : > { %1700 = vmatpush.bf16.msrb.mxu2 %v2216_v62  ;;  %1714 = vmatpush.bf16.msrb.mxu3 %v2220_v37  ;;  %v2370_v62 = vld [vmem:[%s3543_s5 + $0x74] sm:$0xf0]  ;;  %v2366_v37 = vld [vmem:[%s3543_s5 + $0x5c] sm:$0xf] }
 0x24f   : > { %v2128_v0 = vor.u32 %v2370_v62, %v2127_v61  ;;  %v2132_v56 = vor.u32 %v2366_v37, %v2129_v63 }
 0x251   : > { %1677 = vmatmul.bf16.vlgmr.msra.gmra.mxu2 %v3247_v48  ;;  %1691 = vmatmul.bf16.vlgmr.msra.gmra.mxu3 %v3247_v48 }
 0x252   : > { %1701 = vmatpush.bf16.msrb.mxu2 %v2184_v5  ;;  %1715 = vmatpush.bf16.msrb.mxu3 %v2188_v7  ;;  %v2362_v5 = vld [vmem:[%s3543_s5 + $0x34] sm:$0xf0]  ;;  %v2358_v7 = vld [vmem:[%s3543_s5 + $0x1c] sm:$0xf] }
 0x253   : > { %v2096_v8 = vor.u32 %v2362_v5, %v2095_v2  ;;  %v2100_v26 = vor.u32 %v2358_v7, %v2097_v6 }
 0x256   : > { %1702 = vmatpush.bf16.msrb.mxu2 %v2152_v10  ;;  %1716 = vmatpush.bf16.msrb.mxu3 %v2156_v11 }
 0x25a   : > { %1703 = vmatpush.bf16.msrb.mxu2 %v2120_v18  ;;  %1717 = vmatpush.bf16.msrb.mxu3 %v2124_v19 }
 0x25e   : > { %1704 = vmatpush.bf16.msrb.mxu2 %v2088_v28  ;;  %1718 = vmatpush.bf16.msrb.mxu3 %v2092_v29 }
 0x261   : > { %1705 = vmatmul.bf16.vlgmr.msrb.gmra.mxu2 %v3247_v48  ;;  %1719 = vmatmul.bf16.vlgmr.msrb.gmra.mxu3 %v3247_v48 }
 0x262   : > { %1725 = vmatpush.bf16.msra.mxu2 %v2320_v60  ;;  %1739 = vmatpush.bf16.msra.mxu3 %v2324_v30 }
 0x266   : > { %1726 = vmatpush.bf16.msra.mxu2 %v2288_v35  ;;  %1740 = vmatpush.bf16.msra.mxu3 %v2292_v36 }
 0x26a   : > { %1727 = vmatpush.bf16.msra.mxu2 %v2256_v43  ;;  %1741 = vmatpush.bf16.msra.mxu3 %v2260_v44 }
 0x26e   : > { %1728 = vmatpush.bf16.msra.mxu2 %v2224_v27  ;;  %1742 = vmatpush.bf16.msra.mxu3 %v2228_v49 }
 0x272   : > { %1729 = vmatpush.bf16.msra.mxu2 %v2192_v53  ;;  %1743 = vmatpush.bf16.msra.mxu3 %v2196_v50  ;;  %v1310_v53 = vperm.slane %v3437_v9, 5 }
 0x276   : > { %1730 = vmatpush.bf16.msra.mxu2 %v2160_v57  ;;  %1744 = vmatpush.bf16.msra.mxu3 %v2164_v58 }
 0x27a   : > { %1731 = vmatpush.bf16.msra.mxu2 %v2128_v0  ;;  %1745 = vmatpush.bf16.msra.mxu3 %v2132_v56 }
 0x27e   : > { %1732 = vmatpush.bf16.msra.mxu2 %v2096_v8  ;;  %1746 = vmatpush.bf16.msra.mxu3 %v2100_v26  ;;  %v1311_v26 = vperm.slane %v3437_v9, 6 }
 0x281   : > { %1733 = vmatmul.bf16.vlgmr.msra.gmra.mxu2 %v3247_v48  ;;  %1747 = vmatmul.bf16.vlgmr.msra.gmra.mxu3 %v3247_v48 }
 0x2c4   : > { %v1650_v10 = vpop.f32.mrf.mxu2  ;;  %v1664_v11 = vpop.f32.mrf.mxu3 }
 0x2c5   : > { %v1651_v13 = vadd.f32 %v1650_v10, %v1305_v32  ;;  %v1665_v17 = vadd.f32 %v1664_v11, %v1306_v12  ;;  %v1312_v10 = vperm.slane %v3437_v9, 7 }
 0x2c7   : > { %v1753_v1 = vmul.f32 0.2, %v1651_v13  ;;  %v1754_v15 = vmul.f32 0.2, %v1665_v17 }
 0x2c9   : > { %v1769_v46 = vmax.f32 %v1651_v13, %v1753_v1  ;;  %v1770_v24 = vmax.f32 %v1665_v17, %v1754_v15 }
 0x2cc   : > { %v1652_v18 = vpop.f32.mrf.mxu2  ;;  %v1666_v19 = vpop.f32.mrf.mxu3 }
 0x2cd   : > { %v1653_v20 = vadd.f32 %v1652_v18, %v1305_v32  ;;  %v1667_v21 = vadd.f32 %v1666_v19, %v1306_v12 }
 0x2cf   : > { %v1761_v48 = vmul.f32 0.2, %v1653_v20  ;;  %v1762_v22 = vmul.f32 0.2, %v1667_v21 }
 0x2d1   : > { %v1777_v25 = vmax.f32 %v1653_v20, %v1761_v48  ;;  %v1778_v28 = vmax.f32 %v1667_v21, %v1762_v22 }
 0x2d3   : > { %v3441_v29 = vmax.f32 %v1769_v46, %v1777_v25  ;;  %v3443_v60 = vmax.f32 %v1770_v24, %v1778_v28 }
 0x2d4   : > { %v1678_v30 = vpop.f32.mrf.mxu2  ;;  %v1692_v40 = vpop.f32.mrf.mxu3 }
 0x2d5   : > { %v1679_v4 = vadd.f32 %v1678_v30, %v1307_v33  ;;  %v1693_v35 = vadd.f32 %v1692_v40, %v1308_v34 }
 0x2d7   : > { %v1755_v39 = vmul.f32 0.2, %v1679_v4  ;;  %v1756_v42 = vmul.f32 0.2, %v1693_v35 }
 0x2d9   : > { %v1771_v45 = vmax.f32 %v1679_v4, %v1755_v39  ;;  %v1772_v47 = vmax.f32 %v1693_v35, %v1756_v42 }
 0x2dc   : > { %v1680_v36 = vpop.f32.mrf.mxu2  ;;  %v1694_v3 = vpop.f32.mrf.mxu3 }
 0x2dd   : > { %v1681_v16 = vadd.f32 %v1680_v36, %v1307_v33  ;;  %v1695_v43 = vadd.f32 %v1694_v3, %v1308_v34 }
 0x2df   : > { %v1763_v44 = vmul.f32 0.2, %v1681_v16  ;;  %v1764_v41 = vmul.f32 0.2, %v1695_v43 }
 0x2e1   : > { %v1779_v14 = vmax.f32 %v1681_v16, %v1763_v44  ;;  %v1780_v27 = vmax.f32 %v1695_v43, %v1764_v41 }
 0x2e3   : > { %v3447_v49 = vmax.f32 %v1771_v45, %v1779_v14  ;;  %v3449_v51 = vmax.f32 %v1772_v47, %v1780_v27 }
 0x2e4   : > { %v1706_v59 = vpop.f32.mrf.mxu2  ;;  %v1720_v52 = vpop.f32.mrf.mxu3 }
 0x2e5   : > { %v1707_v50 = vadd.f32 %v1706_v59, %v1309_v23  ;;  %v1721_v54 = vadd.f32 %v1720_v52, %v1310_v53 }
 0x2e7   : > { %v1757_v31 = vmul.f32 0.2, %v1707_v50  ;;  %v1758_v57 = vmul.f32 0.2, %v1721_v54 }
 0x2e9   : > { %v1773_v63 = vmax.f32 %v1707_v50, %v1757_v31  ;;  %v1774_v0 = vmax.f32 %v1721_v54, %v1758_v57 }
 0x2ec   : > { %v1708_v55 = vpop.f32.mrf.mxu2  ;;  %v1722_v38 = vpop.f32.mrf.mxu3 }
 0x2ed   : > { %v1709_v58 = vadd.f32 %v1708_v55, %v1309_v23  ;;  %v1723_v61 = vadd.f32 %v1722_v38, %v1310_v53 }
 0x2ef   : > { %v1765_v62 = vmul.f32 0.2, %v1709_v58  ;;  %v1766_v37 = vmul.f32 0.2, %v1723_v61 }
 0x2f1   : > { %v1781_v56 = vmax.f32 %v1709_v58, %v1765_v62  ;;  %v1782_v2 = vmax.f32 %v1723_v61, %v1766_v37 }
 0x2f3   : > { %v1789_v5 = vmax.f32 %v1773_v63, %v1781_v56  ;;  %v1790_v7 = vmax.f32 %v1774_v0, %v1782_v2 }
 0x304   : > { %v1734_v6 = vpop.f32.mrf.mxu2  ;;  %v1748_v8 = vpop.f32.mrf.mxu3 }
 0x305   : > { %v1735_v11 = vadd.f32 %v1734_v6, %v1311_v26  ;;  %v1749_v32 = vadd.f32 %v1748_v8, %v1312_v10 }
 0x307   : > { %v1759_v17 = vmul.f32 0.2, %v1735_v11  ;;  %v1760_v18 = vmul.f32 0.2, %v1749_v32 }
 0x309   : > { %v1775_v21 = vmax.f32 %v1735_v11, %v1759_v17  ;;  %v1776_v48 = vmax.f32 %v1749_v32, %v1760_v18 }
 0x30c   : > { %v1736_v12 = vpop.f32.mrf.mxu2  ;;  %v1750_v13 = vpop.f32.mrf.mxu3 }
 0x30d   : > { %v1737_v19 = vadd.f32 %v1736_v12, %v1311_v26  ;;  %v1751_v1 = vadd.f32 %v1750_v13, %v1312_v10 }
 0x30f   : > { %v1767_v15 = vmul.f32 0.2, %v1737_v19  ;;  %v1768_v20 = vmul.f32 0.2, %v1751_v1  ;;  %1796 = sbr.rel (%p2325_p3) target bundleno = 797 (0x31d), region = 93 }
 0x311   : > { %v1783_v22 = vmax.f32 %v1737_v19, %v1767_v15  ;;  %v1784_v46 = vmax.f32 %v1751_v1, %v1768_v20 }
 0x313   : > { %v1791_v24 = vmax.f32 %v1775_v21, %v1783_v22  ;;  %v1792_v25 = vmax.f32 %v1776_v48, %v1784_v46 }
 0x314   : > { %v2630_v9 = vmov -inf  }
 0x315   : > { %1797 = vst [vmem:[%s3456_s22] sm:$0xff] %v2630_v9 }
 0x316   : > { %1798 = vst [vmem:[%s3456_s22 + $0x8] sm:$0xff] %v2630_v9 }
 0x317   : > { %1799 = vst [vmem:[%s3456_s22 + $0x10] sm:$0xff] %v2630_v9 }
 0x318   : > { %1800 = vst [vmem:[%s3456_s22 + $0x18] sm:$0xff] %v2630_v9 }
 0x319   : > { %1801 = vst [vmem:[%s3456_s22 + $0x20] sm:$0xff] %v2630_v9 }
 0x31a   : > { %1802 = vst [vmem:[%s3456_s22 + $0x28] sm:$0xff] %v2630_v9 }
 0x31b   : > { %1803 = vst [vmem:[%s3456_s22 + $0x30] sm:$0xff] %v2630_v9 }
 0x31c   : > { %1804 = vst [vmem:[%s3456_s22 + $0x38] sm:$0xff] %v2630_v9 }
 0x31d PF: > { %v1805_v28 = vld [vmem:[%s3456_s22] sm:$0xff]  ;;  %v1806_v30 = vld [vmem:[%s3456_s22 + $0x8] sm:$0xff]  ;;  %s2419_s29 = sshll.u32 %s2616_s30, 6  ;;  %s1843_s20 = sshll.u32 %s3456_s22, 4  ;;  %s1844_s20 = int_to_ptr.vmem [resolvable:$true] %s1843_s20 }
 0x31e   : > { %v1807_v40 = vld [vmem:[%s3456_s22 + $0x10] sm:$0xff]  ;;  %v1813_v33 = vmax.f32 %v1805_v28, %v3441_v29  ;;  %v1814_v34 = vmax.f32 %v1806_v30, %v3443_v60  ;;  %s1841_s30 = scalar_lea.hbm %s3545_s7, %s2419_s29  ;;  %s3560_s0 = sand.u32 1, %s2596_s25  }
 0x31f   : > { %v1815_v4 = vmax.f32 %v1807_v40, %v3447_v49  ;;  %v1808_v35 = vld [vmem:[%s3456_s22 + $0x18] sm:$0xff]  ;;  %s1845_s27 = sshll.u32 %s1841_s30, 4  ;;  %s1830_s1 = scalar_lea.sflag [#allocation4], %s3560_s0  ;;  %s1846_s27 = int_to_ptr.hbm [resolvable:$true] %s1845_s27 }
 0x320   : > { %v1809_v36 = vld [vmem:[%s3456_s22 + $0x20] sm:$0xff]  ;;  %v1816_v39 = vmax.f32 %v1808_v35, %v3449_v51  ;;  %1821 = vst [vmem:[%s3456_s22] sm:$0xff] %v1813_v33  ;;  %s2532_s18 = sshra.s32 %s1846_s27, 4  ;;  %s2538_s17 = scalar_lea.hbm %s3545_s7, 128  ;;  %s2533_s18 = int_to_ptr.hbm [resolvable:$true] %s2532_s18 }
 0x321   : > { %v1810_v3 = vld [vmem:[%s3456_s22 + $0x28] sm:$0xff]  ;;  %v1817_v29 = vmax.f32 %v1809_v36, %v1789_v5  ;;  %1822 = vst [vmem:[%s3456_s22 + $0x8] sm:$0xff] %v1814_v34  ;;  %s2534_s21 = scalar_lea.hbm %s2533_s18, 64  ;;  %p2539_p8 = scmp.lt.s32.totalorder %s2533_s18, %s3545_s7 }
 0x322   : > { %v1811_v42 = vld [vmem:[%s3456_s22 + $0x30] sm:$0xff]  ;;  %v1818_v16 = vmax.f32 %v1810_v3, %v1790_v7  ;;  %1823 = vst [vmem:[%s3456_s22 + $0x10] sm:$0xff] %v1815_v4  ;;  %p2535_p4 = scmp.ne.s32.totalorder %s2533_s18, %s2534_s21  ;;  %p2540_p9 = scmp.lt.s32.totalorder %s2538_s17, %s2534_s21 }
 0x323   : > { %v1812_v60 = vld [vmem:[%s3456_s22 + $0x38] sm:$0xff]  ;;  %v1819_v43 = vmax.f32 %v1811_v42, %v1791_v24  ;;  %1824 = vst [vmem:[%s3456_s22 + $0x18] sm:$0xff] %v1816_v39 }
 0x324   : > { %v1820_v44 = vmax.f32 %v1812_v60, %v1792_v25  ;;  %1825 = vst [vmem:[%s3456_s22 + $0x20] sm:$0xff] %v1817_v29  ;;  %p2536_p5 = pnand %p2535_p4, %p2743_p7  ;;  %p2541_p10 = por %p2540_p9, %p2539_p8 }
 0x325   : > { %1826 = vst [vmem:[%s3456_s22 + $0x28] sm:$0xff] %v1818_v16 }
 0x326   : > { %1827 = vst [vmem:[%s3456_s22 + $0x30] sm:$0xff] %v1819_v43  ;;  %p2537_p6 = pneg %p2536_p5 }
 0x327   : > { %1828 = vst [vmem:[%s3456_s22 + $0x38] sm:$0xff] %v1820_v44 }
 0x328   : > { %p2542_p11 = pnand %p2541_p10, %p2537_p6 }
 0x32a   : > { %2545 = shalt.err (!%p2542_p11)
}
 0x32b   : > { %2428 = dma.vmem_to_hbm [thread:$0]  (%p2743_p7), %s1844_s20, 1024, %s1846_s27, %s1830_s1  }
 0x32c PF: > { %p2434_p13 = scmp.ge.s32.totalorder %s2628_s10, 2  ;;  %s1857_s16 = sand.u32 1, %s2592_s24  }
 0x32d   : > { %s1858_s12 = scalar_lea.sflag [#allocation4], %s1857_s16 }
 0x32e   : > { %p2431_p0 = pnand %p2434_p13, %p2751_p12 }
 0x330   : > { %p2432_p1 = pneg %p2431_p0 }
 0x332   : > { %2587 = dma.done.wait (%p2432_p1), %s1858_s12, 1024  }
 0x333   : > { %2589 = vsyncadd (%p2432_p1), %s1858_s12, 4294966272  ;;  %s20_s10 = sadd.s32 1, %s2628_s10   ;;  %s3562_s19 = sld [smem:[#allocation6_spill]] }
 0x334   : > { %p17_p2 = scmp.ge.s32.totalorder %s20_s10, 10   ;;  %s3563_s20 = sld [smem:[#allocation7_spill]] }
 0x335   : > { %s3564_s24 = smov %s2596_s25  ;;  %s3565_s25 = smov %s2600_s26 }
 0x336   : > { %s3566_s26 = smov %s2756_s23  ;;  %s3567_s27 = smov %s2608_s28 }
 0x337   : > { %s3568_s28 = smov %s2759_s11  ;;  %s3569_s29 = smov %s2620_s8 }
 0x338   : > { %s3570_s30 = smov %s2624_s9  ;;  %19 = sbr.rel (!%p17_p2) target bundleno = 9 (0x9), region = 133 }
 0x339   : > { %s3571_s8 = smov %s3562_s19 }
 0x33a   : > { %s3572_s9 = smov %s3563_s20 }
 0x33d   :  { %1864 = vsyncpa [#allocation4], 1 }
 0x33e   :  { %1866 = vsyncpa [#allocation4 + $0x1], 1 }

</bundles_post_ra>
